<compile_context>
chip_gen: v7x
topology: tpu7x:2x2x1
jax: 0.10.0
libtpu: 0.0.40
codegen_flags: <defaults>
</compile_context>

<pallas_src>
import math
import functools

import jax
import jax.numpy as jnp
from jax.experimental import pallas as pl
from jax.experimental.pallas import tpu as pltpu


def _mha_kernel(xq_ref, xk_ref, xv_ref, wqkv_ref, bqkv_ref, wo_ref, bo_ref,
                out_ref, *, batch, seq, d_model, num_heads, d_k):
    scale = 1.0 / math.sqrt(d_k)
    n = batch * seq

    # Activations loaded once; bf16 cast in-kernel (free VPU cast, no extra
    # HBM traffic from wrapper-side casts).
    xq = xq_ref[...].astype(jnp.bfloat16)   # (B*S, D)
    xk = xk_ref[...].astype(jnp.bfloat16)
    xv = xv_ref[...].astype(jnp.bfloat16)

    out_acc = jnp.zeros((n, d_model), jnp.float32)

    # Static (unrolled) head loop: H independent chains of MXU/VPU/EUP work
    # that the scheduler can interleave; head split/concat live entirely in
    # the head-major weight layout, so there are no in-kernel lane relayouts.
    for h in range(num_heads):
        wq_h = wqkv_ref[0, h].astype(jnp.bfloat16)   # (D, dk)
        wk_h = wqkv_ref[1, h].astype(jnp.bfloat16)
        wv_h = wqkv_ref[2, h].astype(jnp.bfloat16)
        bq_h = bqkv_ref[0, h]                        # (dk,) f32
        bk_h = bqkv_ref[1, h]
        bv_h = bqkv_ref[2, h]

        # Per-head projections: bf16 operands on the MXU, f32 accumulation,
        # f32 bias; 1/sqrt(dk) folded into q_h (n*dk elems, not n*n scores).
        q_h = (jnp.dot(xq, wq_h, preferred_element_type=jnp.float32) + bq_h) * scale
        k_h = jnp.dot(xk, wk_h, preferred_element_type=jnp.float32) + bk_h
        v_h = jnp.dot(xv, wv_h, preferred_element_type=jnp.float32) + bv_h

        # (B*S, dk) -> (B, S, dk): leading-dim split only (layout no-op).
        q3 = q_h.reshape(batch, seq, d_k).astype(jnp.bfloat16)
        k3 = k_h.reshape(batch, seq, d_k).astype(jnp.bfloat16)
        v3 = v_h.reshape(batch, seq, d_k).astype(jnp.bfloat16)

        # Batched-over-B attention for this head; scores/softmax in f32.
        s = jnp.einsum("bqd,bkd->bqk", q3, k3,
                       preferred_element_type=jnp.float32)      # (B, S, S)
        m = jnp.max(s, axis=-1, keepdims=True)
        e = jnp.exp(s - m)
        p = e * pl.reciprocal(jnp.sum(e, axis=-1, keepdims=True), approx=True)
        ctx = jnp.einsum("bqk,bkd->bqd", p.astype(jnp.bfloat16), v3,
                         preferred_element_type=jnp.float32)    # (B, S, dk)

        # Head-concat + W_o folded into a register accumulation:
        #   out += ctx_h @ W_o[h*dk:(h+1)*dk, :]   (no concat, no scratch).
        wo_h = wo_ref[h].astype(jnp.bfloat16)                   # (dk, D)
        out_acc = out_acc + jnp.dot(ctx.reshape(n, d_k).astype(jnp.bfloat16),
                                    wo_h, preferred_element_type=jnp.float32)

    # NOTE: last dim is 32 (<128 lanes) so these stores are masked partials;
    # at production D (multiple of 128) they become unmasked lane-dense vst.
    out_ref[...] = (out_acc + bo_ref[...]).astype(out_ref.dtype)


def multi_head_attention(q_enc, k_enc, v_enc, params, *, num_heads: int):
    B, S, D = q_enc.shape
    assert D % num_heads == 0
    d_k = D // num_heads
    n = B * S
    wq, bq, wk, bk, wv, bv, wo, bo = params

    # One-time weight prep (head-major layout + packing).  In a real model this
    # is done once at parameter-load time; it folds the head split / concat
    # into the weight layout so the kernel needs no in-kernel relayouts.
    # Weights stay f32; bf16 casts happen in-kernel.
    def head_major_in(w):     # (D, D) -> (H, D, dk): column block of head h
        return w.reshape(D, num_heads, d_k).transpose(1, 0, 2)

    wqkv = jnp.stack([head_major_in(wq), head_major_in(wk), head_major_in(wv)])  # (3,H,D,dk)
    bqkv = jnp.stack([bq.reshape(num_heads, d_k),
                      bk.reshape(num_heads, d_k),
                      bv.reshape(num_heads, d_k)])                               # (3,H,dk)
    wo_heads = wo.reshape(num_heads, d_k, D)                                     # (H,dk,D)
    bo2 = bo.reshape(1, D)

    # Activations flattened to (B*S, D) (free metadata reshape); no wrapper
    # dtype casts.
    xq = q_enc.reshape(n, D)
    xk = k_enc.reshape(n, D)
    xv = v_enc.reshape(n, D)

    kernel = functools.partial(_mha_kernel, batch=B, seq=S, d_model=D,
                               num_heads=num_heads, d_k=d_k)

    def full(shape):
        return pl.BlockSpec(shape, lambda i, _s=shape: (0,) * len(_s))

    out = pl.pallas_call(
        kernel,
        out_shape=jax.ShapeDtypeStruct((n, D), q_enc.dtype),
        grid=(1,),  # single step: whole problem is trivially VMEM-resident
        in_specs=[full((n, D)), full((n, D)), full((n, D)),
                  full((3, num_heads, D, d_k)),
                  full((3, num_heads, d_k)),
                  full((num_heads, d_k, D)),
                  full((1, D))],
        out_specs=full((n, D)),
        compiler_params=pltpu.CompilerParams(
            dimension_semantics=("arbitrary",)),
    )(xq, xk, xv, wqkv, bqkv, wo_heads, bo2)

    return out.reshape(B, S, D)


def _reference(q_enc, k_enc, v_enc, params, *, num_heads: int):
    """Pure-JAX f32 reference mirroring the PyTorch forward (mask=None, eval)."""
    wq, bq, wk, bk, wv, bv, wo, bo = params
    B, S, D = q_enc.shape
    d_k = D // num_heads

    q = q_enc @ wq + bq
    k = k_enc @ wk + bk
    v = v_enc @ wv + bv

    def split(x):
        return x.reshape(B, S, num_heads, d_k).transpose(0, 2, 1, 3)  # (B,H,S,dk)

    qh, kh, vh = split(q), split(k), split(v)
    scores = jnp.einsum("bhqd,bhkd->bhqk", qh, kh) / math.sqrt(d_k)
    attn = jax.nn.softmax(scores, axis=-1)
    ctx = jnp.einsum("bhqk,bhkd->bhqd", attn, vh)            # (B,H,S,dk)
    ctx = ctx.transpose(0, 2, 1, 3).reshape(B, S, D)         # concat heads
    return ctx @ wo + bo


if __name__ == "__main__":
    B, S, D, H = 2, 8, 32, 4  # batch, seq, d_model, num_heads

    key = jax.random.PRNGKey(0)
    keys = jax.random.split(key, 12)

    # Deterministic parameter init (shapes match nn.Linear(d_model, d_model);
    # weights stored (D_in, D_out) so y = x @ W + b).
    scale = 1.0 / math.sqrt(D)
    wq = jax.random.uniform(keys[0], (D, D), jnp.float32, -scale, scale)
    bq = jax.random.uniform(keys[1], (D,), jnp.float32, -scale, scale)
    wk = jax.random.uniform(keys[2], (D, D), jnp.float32, -scale, scale)
    bk = jax.random.uniform(keys[3], (D,), jnp.float32, -scale, scale)
    wv = jax.random.uniform(keys[4], (D, D), jnp.float32, -scale, scale)
    bv = jax.random.uniform(keys[5], (D,), jnp.float32, -scale, scale)
    wo = jax.random.uniform(keys[6], (D, D), jnp.float32, -scale, scale)
    bo = jax.random.uniform(keys[7], (D,), jnp.float32, -scale, scale)
    params = (wq, bq, wk, bk, wv, bv, wo, bo)

    q_enc = jax.random.normal(keys[8], (B, S, D), jnp.float32)
    k_enc = jax.random.normal(keys[9], (B, S, D), jnp.float32)
    v_enc = jax.random.normal(keys[10], (B, S, D), jnp.float32)

    out = multi_head_attention(q_enc, k_enc, v_enc, params, num_heads=H)
    out = jax.block_until_ready(out)

    ref = _reference(q_enc, k_enc, v_enc, params, num_heads=H)
    assert out.shape == (B, S, D)
    # bf16 matmul operands + approx reciprocal => loosen tolerance vs f32 ref.
    assert jnp.allclose(out, ref, atol=5e-2, rtol=5e-2), "mismatch vs reference"

    print("KERNEL_OK")
</pallas_src>

<mosaic_0001>
module attributes {stable_mosaic.version = 11 : i64} {
  func.func @_mha_kernel(%arg0: i32, %arg1: memref<16x32xf32, #tpu.memory_space<vmem>>, %arg2: memref<16x32xf32, #tpu.memory_space<vmem>>, %arg3: memref<16x32xf32, #tpu.memory_space<vmem>>, %arg4: memref<3x4x32x8xf32, #tpu.memory_space<vmem>>, %arg5: memref<3x4x8xf32, #tpu.memory_space<vmem>>, %arg6: memref<4x8x32xf32, #tpu.memory_space<vmem>>, %arg7: memref<1x32xf32, #tpu.memory_space<vmem>>, %arg8: memref<16x32xf32, #tpu.memory_space<vmem>>) attributes {dimension_semantics = [#tpu.dimension_semantics<arbitrary>], iteration_bounds = array<i64: 1>, scalar_prefetch = 0 : i64, scratch_operands = 0 : i64, tpu.core_type = #tpu.core_type<tc>, window_params = [{pipeline_mode = #tpu.pipeline_mode<synchronous>, transform_indices = @transform_0, window_bounds = array<i64: 16, 32>}, {pipeline_mode = #tpu.pipeline_mode<synchronous>, transform_indices = @transform_1, window_bounds = array<i64: 16, 32>}, {pipeline_mode = #tpu.pipeline_mode<synchronous>, transform_indices = @transform_2, window_bounds = array<i64: 16, 32>}, {pipeline_mode = #tpu.pipeline_mode<synchronous>, transform_indices = @transform_3, window_bounds = array<i64: 3, 4, 32, 8>}, {pipeline_mode = #tpu.pipeline_mode<synchronous>, transform_indices = @transform_4, window_bounds = array<i64: 3, 4, 8>}, {pipeline_mode = #tpu.pipeline_mode<synchronous>, transform_indices = @transform_5, window_bounds = array<i64: 4, 8, 32>}, {pipeline_mode = #tpu.pipeline_mode<synchronous>, transform_indices = @transform_6, window_bounds = array<i64: 1, 32>}, {pipeline_mode = #tpu.pipeline_mode<synchronous>, transform_indices = @transform_7, window_bounds = array<i64: 16, 32>}]} {
    %c0 = arith.constant 0 : index
    %c0_0 = arith.constant 0 : index
    %0 = vector.load %arg1[%c0, %c0_0] : memref<16x32xf32, #tpu.memory_space<vmem>>, vector<16x32xf32>
    %1 = arith.truncf %0 : vector<16x32xf32> to vector<16x32xbf16>
    %c0_1 = arith.constant 0 : index
    %c0_2 = arith.constant 0 : index
    %2 = vector.load %arg2[%c0_1, %c0_2] : memref<16x32xf32, #tpu.memory_space<vmem>>, vector<16x32xf32>
    %3 = arith.truncf %2 : vector<16x32xf32> to vector<16x32xbf16>
    %c0_3 = arith.constant 0 : index
    %c0_4 = arith.constant 0 : index
    %4 = vector.load %arg3[%c0_3, %c0_4] : memref<16x32xf32, #tpu.memory_space<vmem>>, vector<16x32xf32>
    %5 = arith.truncf %4 : vector<16x32xf32> to vector<16x32xbf16>
    %cst = arith.constant 0.000000e+00 : f32
    %6 = vector.broadcast %cst : f32 to vector<16x32xf32>
    %c0_5 = arith.constant 0 : index
    %c0_6 = arith.constant 0 : index
    %c0_7 = arith.constant 0 : index
    %c0_8 = arith.constant 0 : index
    %7 = vector.load %arg4[%c0_5, %c0_6, %c0_7, %c0_8] : memref<3x4x32x8xf32, #tpu.memory_space<vmem>>, vector<1x1x32x8xf32>
    %8 = vector.shape_cast %7 : vector<1x1x32x8xf32> to vector<32x8xf32>
    %9 = arith.truncf %8 : vector<32x8xf32> to vector<32x8xbf16>
    %c1 = arith.constant 1 : index
    %c0_9 = arith.constant 0 : index
    %c0_10 = arith.constant 0 : index
    %c0_11 = arith.constant 0 : index
    %10 = vector.load %arg4[%c1, %c0_9, %c0_10, %c0_11] : memref<3x4x32x8xf32, #tpu.memory_space<vmem>>, vector<1x1x32x8xf32>
    %11 = vector.shape_cast %10 : vector<1x1x32x8xf32> to vector<32x8xf32>
    %12 = arith.truncf %11 : vector<32x8xf32> to vector<32x8xbf16>
    %c2 = arith.constant 2 : index
    %c0_12 = arith.constant 0 : index
    %c0_13 = arith.constant 0 : index
    %c0_14 = arith.constant 0 : index
    %13 = vector.load %arg4[%c2, %c0_12, %c0_13, %c0_14] : memref<3x4x32x8xf32, #tpu.memory_space<vmem>>, vector<1x1x32x8xf32>
    %14 = vector.shape_cast %13 : vector<1x1x32x8xf32> to vector<32x8xf32>
    %15 = arith.truncf %14 : vector<32x8xf32> to vector<32x8xbf16>
    %c0_15 = arith.constant 0 : index
    %c0_16 = arith.constant 0 : index
    %c0_17 = arith.constant 0 : index
    %16 = vector.load %arg5[%c0_15, %c0_16, %c0_17] : memref<3x4x8xf32, #tpu.memory_space<vmem>>, vector<1x1x8xf32>
    %17 = vector.shape_cast %16 : vector<1x1x8xf32> to vector<8xf32>
    %c1_18 = arith.constant 1 : index
    %c0_19 = arith.constant 0 : index
    %c0_20 = arith.constant 0 : index
    %18 = vector.load %arg5[%c1_18, %c0_19, %c0_20] : memref<3x4x8xf32, #tpu.memory_space<vmem>>, vector<1x1x8xf32>
    %19 = vector.shape_cast %18 : vector<1x1x8xf32> to vector<8xf32>
    %c2_21 = arith.constant 2 : index
    %c0_22 = arith.constant 0 : index
    %c0_23 = arith.constant 0 : index
    %20 = vector.load %arg5[%c2_21, %c0_22, %c0_23] : memref<3x4x8xf32, #tpu.memory_space<vmem>>, vector<1x1x8xf32>
    %21 = vector.shape_cast %20 : vector<1x1x8xf32> to vector<8xf32>
    %cst_24 = arith.constant dense<0.000000e+00> : vector<16x8xf32>
    %22 = tpu.matmul %1, %9, %cst_24 {dimension_numbers = #tpu.dot_dimension_numbers<[1], [0], [0], [1], [0, 0, 1, 1], [], []>} : vector<16x32xbf16>, vector<32x8xbf16>, vector<16x8xf32> -> vector<16x8xf32>
    %23 = vector.shape_cast %17 : vector<8xf32> to vector<1x8xf32>
    %24 = vector.broadcast %23 : vector<1x8xf32> to vector<16x8xf32>
    %25 = arith.addf %22, %24 : vector<16x8xf32>
    %cst_25 = arith.constant 0.353553385 : f32
    %26 = vector.broadcast %cst_25 : f32 to vector<16x8xf32>
    %27 = arith.mulf %25, %26 : vector<16x8xf32>
    %cst_26 = arith.constant dense<0.000000e+00> : vector<16x8xf32>
    %28 = tpu.matmul %3, %12, %cst_26 {dimension_numbers = #tpu.dot_dimension_numbers<[1], [0], [0], [1], [0, 0, 1, 1], [], []>} : vector<16x32xbf16>, vector<32x8xbf16>, vector<16x8xf32> -> vector<16x8xf32>
    %29 = vector.shape_cast %19 : vector<8xf32> to vector<1x8xf32>
    %30 = vector.broadcast %29 : vector<1x8xf32> to vector<16x8xf32>
    %31 = arith.addf %28, %30 : vector<16x8xf32>
    %cst_27 = arith.constant dense<0.000000e+00> : vector<16x8xf32>
    %32 = tpu.matmul %5, %15, %cst_27 {dimension_numbers = #tpu.dot_dimension_numbers<[1], [0], [0], [1], [0, 0, 1, 1], [], []>} : vector<16x32xbf16>, vector<32x8xbf16>, vector<16x8xf32> -> vector<16x8xf32>
    %33 = vector.shape_cast %21 : vector<8xf32> to vector<1x8xf32>
    %34 = vector.broadcast %33 : vector<1x8xf32> to vector<16x8xf32>
    %35 = arith.addf %32, %34 : vector<16x8xf32>
    %36 = vector.shape_cast %27 : vector<16x8xf32> to vector<2x8x8xf32>
    %37 = arith.truncf %36 : vector<2x8x8xf32> to vector<2x8x8xbf16>
    %38 = vector.shape_cast %31 : vector<16x8xf32> to vector<2x8x8xf32>
    %39 = arith.truncf %38 : vector<2x8x8xf32> to vector<2x8x8xbf16>
    %40 = vector.shape_cast %35 : vector<16x8xf32> to vector<2x8x8xf32>
    %41 = arith.truncf %40 : vector<2x8x8xf32> to vector<2x8x8xbf16>
    "tpu.trace_start"() <{level = 10 : i32, message = "bqd,bkd->bqk"}> : () -> ()
    %cst_28 = arith.constant dense<0.000000e+00> : vector<2x8x8xf32>
    %42 = tpu.matmul %37, %39, %cst_28 {dimension_numbers = #tpu.dot_dimension_numbers<[2], [2], [1], [1], [0, 0, 0, 1, 1, 1], [0], [0]>} : vector<2x8x8xbf16>, vector<2x8x8xbf16>, vector<2x8x8xf32> -> vector<2x8x8xf32>
    "tpu.trace_stop"() : () -> ()
    %cst_29 = arith.constant dense<0xFF800000> : vector<2x8xf32>
    %43 = vector.multi_reduction <maximumf>, %42, %cst_29 [2] : vector<2x8x8xf32> to vector<2x8xf32>
    %44 = vector.shape_cast %43 : vector<2x8xf32> to vector<2x8x1xf32>
    %45 = vector.broadcast %44 : vector<2x8x1xf32> to vector<2x8x8xf32>
    %46 = arith.subf %42, %45 : vector<2x8x8xf32>
    %47 = math.exp %46 : vector<2x8x8xf32>
    %cst_30 = arith.constant dense<0.000000e+00> : vector<2x8xf32>
    %48 = vector.multi_reduction <add>, %47, %cst_30 [2] : vector<2x8x8xf32> to vector<2x8xf32>
    %49 = vector.shape_cast %48 : vector<2x8xf32> to vector<2x8x1xf32>
    %50 = tpu.reciprocal %49 {approx = true} : vector<2x8x1xf32> -> vector<2x8x1xf32>
    %51 = vector.broadcast %50 : vector<2x8x1xf32> to vector<2x8x8xf32>
    %52 = arith.mulf %47, %51 : vector<2x8x8xf32>
    %53 = arith.truncf %52 : vector<2x8x8xf32> to vector<2x8x8xbf16>
    "tpu.trace_start"() <{level = 10 : i32, message = "bqk,bkd->bqd"}> : () -> ()
    %cst_31 = arith.constant dense<0.000000e+00> : vector<2x8x8xf32>
    %54 = tpu.matmul %53, %41, %cst_31 {dimension_numbers = #tpu.dot_dimension_numbers<[2], [1], [1], [2], [0, 0, 0, 1, 1, 2], [0], [0]>} : vector<2x8x8xbf16>, vector<2x8x8xbf16>, vector<2x8x8xf32> -> vector<2x8x8xf32>
    "tpu.trace_stop"() : () -> ()
    %c0_32 = arith.constant 0 : index
    %c0_33 = arith.constant 0 : index
    %c0_34 = arith.constant 0 : index
    %55 = vector.load %arg6[%c0_32, %c0_33, %c0_34] : memref<4x8x32xf32, #tpu.memory_space<vmem>>, vector<1x8x32xf32>
    %56 = vector.shape_cast %55 : vector<1x8x32xf32> to vector<8x32xf32>
    %57 = arith.truncf %56 : vector<8x32xf32> to vector<8x32xbf16>
    %58 = vector.shape_cast %54 : vector<2x8x8xf32> to vector<16x8xf32>
    %59 = arith.truncf %58 : vector<16x8xf32> to vector<16x8xbf16>
    %cst_35 = arith.constant dense<0.000000e+00> : vector<16x32xf32>
    %60 = tpu.matmul %59, %57, %cst_35 {dimension_numbers = #tpu.dot_dimension_numbers<[1], [0], [0], [1], [0, 0, 1, 1], [], []>} : vector<16x8xbf16>, vector<8x32xbf16>, vector<16x32xf32> -> vector<16x32xf32>
    %61 = arith.addf %6, %60 : vector<16x32xf32>
    %c0_36 = arith.constant 0 : index
    %c1_37 = arith.constant 1 : index
    %c0_38 = arith.constant 0 : index
    %c0_39 = arith.constant 0 : index
    %62 = vector.load %arg4[%c0_36, %c1_37, %c0_38, %c0_39] : memref<3x4x32x8xf32, #tpu.memory_space<vmem>>, vector<1x1x32x8xf32>
    %63 = vector.shape_cast %62 : vector<1x1x32x8xf32> to vector<32x8xf32>
    %64 = arith.truncf %63 : vector<32x8xf32> to vector<32x8xbf16>
    %c1_40 = arith.constant 1 : index
    %c1_41 = arith.constant 1 : index
    %c0_42 = arith.constant 0 : index
    %c0_43 = arith.constant 0 : index
    %65 = vector.load %arg4[%c1_40, %c1_41, %c0_42, %c0_43] : memref<3x4x32x8xf32, #tpu.memory_space<vmem>>, vector<1x1x32x8xf32>
    %66 = vector.shape_cast %65 : vector<1x1x32x8xf32> to vector<32x8xf32>
    %67 = arith.truncf %66 : vector<32x8xf32> to vector<32x8xbf16>
    %c2_44 = arith.constant 2 : index
    %c1_45 = arith.constant 1 : index
    %c0_46 = arith.constant 0 : index
    %c0_47 = arith.constant 0 : index
    %68 = vector.load %arg4[%c2_44, %c1_45, %c0_46, %c0_47] : memref<3x4x32x8xf32, #tpu.memory_space<vmem>>, vector<1x1x32x8xf32>
    %69 = vector.shape_cast %68 : vector<1x1x32x8xf32> to vector<32x8xf32>
    %70 = arith.truncf %69 : vector<32x8xf32> to vector<32x8xbf16>
    %c0_48 = arith.constant 0 : index
    %c1_49 = arith.constant 1 : index
    %c0_50 = arith.constant 0 : index
    %71 = vector.load %arg5[%c0_48, %c1_49, %c0_50] : memref<3x4x8xf32, #tpu.memory_space<vmem>>, vector<1x1x8xf32>
    %72 = vector.shape_cast %71 : vector<1x1x8xf32> to vector<8xf32>
    %c1_51 = arith.constant 1 : index
    %c1_52 = arith.constant 1 : index
    %c0_53 = arith.constant 0 : index
    %73 = vector.load %arg5[%c1_51, %c1_52, %c0_53] : memref<3x4x8xf32, #tpu.memory_space<vmem>>, vector<1x1x8xf32>
    %74 = vector.shape_cast %73 : vector<1x1x8xf32> to vector<8xf32>
    %c2_54 = arith.constant 2 : index
    %c1_55 = arith.constant 1 : index
    %c0_56 = arith.constant 0 : index
    %75 = vector.load %arg5[%c2_54, %c1_55, %c0_56] : memref<3x4x8xf32, #tpu.memory_space<vmem>>, vector<1x1x8xf32>
    %76 = vector.shape_cast %75 : vector<1x1x8xf32> to vector<8xf32>
    %cst_57 = arith.constant dense<0.000000e+00> : vector<16x8xf32>
    %77 = tpu.matmul %1, %64, %cst_57 {dimension_numbers = #tpu.dot_dimension_numbers<[1], [0], [0], [1], [0, 0, 1, 1], [], []>} : vector<16x32xbf16>, vector<32x8xbf16>, vector<16x8xf32> -> vector<16x8xf32>
    %78 = vector.shape_cast %72 : vector<8xf32> to vector<1x8xf32>
    %79 = vector.broadcast %78 : vector<1x8xf32> to vector<16x8xf32>
    %80 = arith.addf %77, %79 : vector<16x8xf32>
    %cst_58 = arith.constant 0.353553385 : f32
    %81 = vector.broadcast %cst_58 : f32 to vector<16x8xf32>
    %82 = arith.mulf %80, %81 : vector<16x8xf32>
    %cst_59 = arith.constant dense<0.000000e+00> : vector<16x8xf32>
    %83 = tpu.matmul %3, %67, %cst_59 {dimension_numbers = #tpu.dot_dimension_numbers<[1], [0], [0], [1], [0, 0, 1, 1], [], []>} : vector<16x32xbf16>, vector<32x8xbf16>, vector<16x8xf32> -> vector<16x8xf32>
    %84 = vector.shape_cast %74 : vector<8xf32> to vector<1x8xf32>
    %85 = vector.broadcast %84 : vector<1x8xf32> to vector<16x8xf32>
    %86 = arith.addf %83, %85 : vector<16x8xf32>
    %cst_60 = arith.constant dense<0.000000e+00> : vector<16x8xf32>
    %87 = tpu.matmul %5, %70, %cst_60 {dimension_numbers = #tpu.dot_dimension_numbers<[1], [0], [0], [1], [0, 0, 1, 1], [], []>} : vector<16x32xbf16>, vector<32x8xbf16>, vector<16x8xf32> -> vector<16x8xf32>
    %88 = vector.shape_cast %76 : vector<8xf32> to vector<1x8xf32>
    %89 = vector.broadcast %88 : vector<1x8xf32> to vector<16x8xf32>
    %90 = arith.addf %87, %89 : vector<16x8xf32>
    %91 = vector.shape_cast %82 : vector<16x8xf32> to vector<2x8x8xf32>
    %92 = arith.truncf %91 : vector<2x8x8xf32> to vector<2x8x8xbf16>
    %93 = vector.shape_cast %86 : vector<16x8xf32> to vector<2x8x8xf32>
    %94 = arith.truncf %93 : vector<2x8x8xf32> to vector<2x8x8xbf16>
    %95 = vector.shape_cast %90 : vector<16x8xf32> to vector<2x8x8xf32>
    %96 = arith.truncf %95 : vector<2x8x8xf32> to vector<2x8x8xbf16>
    "tpu.trace_start"() <{level = 10 : i32, message = "bqd,bkd->bqk"}> : () -> ()
    %cst_61 = arith.constant dense<0.000000e+00> : vector<2x8x8xf32>
    %97 = tpu.matmul %92, %94, %cst_61 {dimension_numbers = #tpu.dot_dimension_numbers<[2], [2], [1], [1], [0, 0, 0, 1, 1, 1], [0], [0]>} : vector<2x8x8xbf16>, vector<2x8x8xbf16>, vector<2x8x8xf32> -> vector<2x8x8xf32>
    "tpu.trace_stop"() : () -> ()
    %cst_62 = arith.constant dense<0xFF800000> : vector<2x8xf32>
    %98 = vector.multi_reduction <maximumf>, %97, %cst_62 [2] : vector<2x8x8xf32> to vector<2x8xf32>
    %99 = vector.shape_cast %98 : vector<2x8xf32> to vector<2x8x1xf32>
    %100 = vector.broadcast %99 : vector<2x8x1xf32> to vector<2x8x8xf32>
    %101 = arith.subf %97, %100 : vector<2x8x8xf32>
    %102 = math.exp %101 : vector<2x8x8xf32>
    %cst_63 = arith.constant dense<0.000000e+00> : vector<2x8xf32>
    %103 = vector.multi_reduction <add>, %102, %cst_63 [2] : vector<2x8x8xf32> to vector<2x8xf32>
    %104 = vector.shape_cast %103 : vector<2x8xf32> to vector<2x8x1xf32>
    %105 = tpu.reciprocal %104 {approx = true} : vector<2x8x1xf32> -> vector<2x8x1xf32>
    %106 = vector.broadcast %105 : vector<2x8x1xf32> to vector<2x8x8xf32>
    %107 = arith.mulf %102, %106 : vector<2x8x8xf32>
    %108 = arith.truncf %107 : vector<2x8x8xf32> to vector<2x8x8xbf16>
    "tpu.trace_start"() <{level = 10 : i32, message = "bqk,bkd->bqd"}> : () -> ()
    %cst_64 = arith.constant dense<0.000000e+00> : vector<2x8x8xf32>
    %109 = tpu.matmul %108, %96, %cst_64 {dimension_numbers = #tpu.dot_dimension_numbers<[2], [1], [1], [2], [0, 0, 0, 1, 1, 2], [0], [0]>} : vector<2x8x8xbf16>, vector<2x8x8xbf16>, vector<2x8x8xf32> -> vector<2x8x8xf32>
    "tpu.trace_stop"() : () -> ()
    %c1_65 = arith.constant 1 : index
    %c0_66 = arith.constant 0 : index
    %c0_67 = arith.constant 0 : index
    %110 = vector.load %arg6[%c1_65, %c0_66, %c0_67] : memref<4x8x32xf32, #tpu.memory_space<vmem>>, vector<1x8x32xf32>
    %111 = vector.shape_cast %110 : vector<1x8x32xf32> to vector<8x32xf32>
    %112 = arith.truncf %111 : vector<8x32xf32> to vector<8x32xbf16>
    %113 = vector.shape_cast %109 : vector<2x8x8xf32> to vector<16x8xf32>
    %114 = arith.truncf %113 : vector<16x8xf32> to vector<16x8xbf16>
    %cst_68 = arith.constant dense<0.000000e+00> : vector<16x32xf32>
    %115 = tpu.matmul %114, %112, %cst_68 {dimension_numbers = #tpu.dot_dimension_numbers<[1], [0], [0], [1], [0, 0, 1, 1], [], []>} : vector<16x8xbf16>, vector<8x32xbf16>, vector<16x32xf32> -> vector<16x32xf32>
    %116 = arith.addf %61, %115 : vector<16x32xf32>
    %c0_69 = arith.constant 0 : index
    %c2_70 = arith.constant 2 : index
    %c0_71 = arith.constant 0 : index
    %c0_72 = arith.constant 0 : index
    %117 = vector.load %arg4[%c0_69, %c2_70, %c0_71, %c0_72] : memref<3x4x32x8xf32, #tpu.memory_space<vmem>>, vector<1x1x32x8xf32>
    %118 = vector.shape_cast %117 : vector<1x1x32x8xf32> to vector<32x8xf32>
    %119 = arith.truncf %118 : vector<32x8xf32> to vector<32x8xbf16>
    %c1_73 = arith.constant 1 : index
    %c2_74 = arith.constant 2 : index
    %c0_75 = arith.constant 0 : index
    %c0_76 = arith.constant 0 : index
    %120 = vector.load %arg4[%c1_73, %c2_74, %c0_75, %c0_76] : memref<3x4x32x8xf32, #tpu.memory_space<vmem>>, vector<1x1x32x8xf32>
    %121 = vector.shape_cast %120 : vector<1x1x32x8xf32> to vector<32x8xf32>
    %122 = arith.truncf %121 : vector<32x8xf32> to vector<32x8xbf16>
    %c2_77 = arith.constant 2 : index
    %c2_78 = arith.constant 2 : index
    %c0_79 = arith.constant 0 : index
    %c0_80 = arith.constant 0 : index
    %123 = vector.load %arg4[%c2_77, %c2_78, %c0_79, %c0_80] : memref<3x4x32x8xf32, #tpu.memory_space<vmem>>, vector<1x1x32x8xf32>
    %124 = vector.shape_cast %123 : vector<1x1x32x8xf32> to vector<32x8xf32>
    %125 = arith.truncf %124 : vector<32x8xf32> to vector<32x8xbf16>
    %c0_81 = arith.constant 0 : index
    %c2_82 = arith.constant 2 : index
    %c0_83 = arith.constant 0 : index
    %126 = vector.load %arg5[%c0_81, %c2_82, %c0_83] : memref<3x4x8xf32, #tpu.memory_space<vmem>>, vector<1x1x8xf32>
    %127 = vector.shape_cast %126 : vector<1x1x8xf32> to vector<8xf32>
    %c1_84 = arith.constant 1 : index
    %c2_85 = arith.constant 2 : index
    %c0_86 = arith.constant 0 : index
    %128 = vector.load %arg5[%c1_84, %c2_85, %c0_86] : memref<3x4x8xf32, #tpu.memory_space<vmem>>, vector<1x1x8xf32>
    %129 = vector.shape_cast %128 : vector<1x1x8xf32> to vector<8xf32>
    %c2_87 = arith.constant 2 : index
    %c2_88 = arith.constant 2 : index
    %c0_89 = arith.constant 0 : index
    %130 = vector.load %arg5[%c2_87, %c2_88, %c0_89] : memref<3x4x8xf32, #tpu.memory_space<vmem>>, vector<1x1x8xf32>
    %131 = vector.shape_cast %130 : vector<1x1x8xf32> to vector<8xf32>
    %cst_90 = arith.constant dense<0.000000e+00> : vector<16x8xf32>
    %132 = tpu.matmul %1, %119, %cst_90 {dimension_numbers = #tpu.dot_dimension_numbers<[1], [0], [0], [1], [0, 0, 1, 1], [], []>} : vector<16x32xbf16>, vector<32x8xbf16>, vector<16x8xf32> -> vector<16x8xf32>
    %133 = vector.shape_cast %127 : vector<8xf32> to vector<1x8xf32>
    %134 = vector.broadcast %133 : vector<1x8xf32> to vector<16x8xf32>
    %135 = arith.addf %132, %134 : vector<16x8xf32>
    %cst_91 = arith.constant 0.353553385 : f32
    %136 = vector.broadcast %cst_91 : f32 to vector<16x8xf32>
    %137 = arith.mulf %135, %136 : vector<16x8xf32>
    %cst_92 = arith.constant dense<0.000000e+00> : vector<16x8xf32>
    %138 = tpu.matmul %3, %122, %cst_92 {dimension_numbers = #tpu.dot_dimension_numbers<[1], [0], [0], [1], [0, 0, 1, 1], [], []>} : vector<16x32xbf16>, vector<32x8xbf16>, vector<16x8xf32> -> vector<16x8xf32>
    %139 = vector.shape_cast %129 : vector<8xf32> to vector<1x8xf32>
    %140 = vector.broadcast %139 : vector<1x8xf32> to vector<16x8xf32>
    %141 = arith.addf %138, %140 : vector<16x8xf32>
    %cst_93 = arith.constant dense<0.000000e+00> : vector<16x8xf32>
    %142 = tpu.matmul %5, %125, %cst_93 {dimension_numbers = #tpu.dot_dimension_numbers<[1], [0], [0], [1], [0, 0, 1, 1], [], []>} : vector<16x32xbf16>, vector<32x8xbf16>, vector<16x8xf32> -> vector<16x8xf32>
    %143 = vector.shape_cast %131 : vector<8xf32> to vector<1x8xf32>
    %144 = vector.broadcast %143 : vector<1x8xf32> to vector<16x8xf32>
    %145 = arith.addf %142, %144 : vector<16x8xf32>
    %146 = vector.shape_cast %137 : vector<16x8xf32> to vector<2x8x8xf32>
    %147 = arith.truncf %146 : vector<2x8x8xf32> to vector<2x8x8xbf16>
    %148 = vector.shape_cast %141 : vector<16x8xf32> to vector<2x8x8xf32>
    %149 = arith.truncf %148 : vector<2x8x8xf32> to vector<2x8x8xbf16>
    %150 = vector.shape_cast %145 : vector<16x8xf32> to vector<2x8x8xf32>
    %151 = arith.truncf %150 : vector<2x8x8xf32> to vector<2x8x8xbf16>
    "tpu.trace_start"() <{level = 10 : i32, message = "bqd,bkd->bqk"}> : () -> ()
    %cst_94 = arith.constant dense<0.000000e+00> : vector<2x8x8xf32>
    %152 = tpu.matmul %147, %149, %cst_94 {dimension_numbers = #tpu.dot_dimension_numbers<[2], [2], [1], [1], [0, 0, 0, 1, 1, 1], [0], [0]>} : vector<2x8x8xbf16>, vector<2x8x8xbf16>, vector<2x8x8xf32> -> vector<2x8x8xf32>
    "tpu.trace_stop"() : () -> ()
    %cst_95 = arith.constant dense<0xFF800000> : vector<2x8xf32>
    %153 = vector.multi_reduction <maximumf>, %152, %cst_95 [2] : vector<2x8x8xf32> to vector<2x8xf32>
    %154 = vector.shape_cast %153 : vector<2x8xf32> to vector<2x8x1xf32>
    %155 = vector.broadcast %154 : vector<2x8x1xf32> to vector<2x8x8xf32>
    %156 = arith.subf %152, %155 : vector<2x8x8xf32>
    %157 = math.exp %156 : vector<2x8x8xf32>
    %cst_96 = arith.constant dense<0.000000e+00> : vector<2x8xf32>
    %158 = vector.multi_reduction <add>, %157, %cst_96 [2] : vector<2x8x8xf32> to vector<2x8xf32>
    %159 = vector.shape_cast %158 : vector<2x8xf32> to vector<2x8x1xf32>
    %160 = tpu.reciprocal %159 {approx = true} : vector<2x8x1xf32> -> vector<2x8x1xf32>
    %161 = vector.broadcast %160 : vector<2x8x1xf32> to vector<2x8x8xf32>
    %162 = arith.mulf %157, %161 : vector<2x8x8xf32>
    %163 = arith.truncf %162 : vector<2x8x8xf32> to vector<2x8x8xbf16>
    "tpu.trace_start"() <{level = 10 : i32, message = "bqk,bkd->bqd"}> : () -> ()
    %cst_97 = arith.constant dense<0.000000e+00> : vector<2x8x8xf32>
    %164 = tpu.matmul %163, %151, %cst_97 {dimension_numbers = #tpu.dot_dimension_numbers<[2], [1], [1], [2], [0, 0, 0, 1, 1, 2], [0], [0]>} : vector<2x8x8xbf16>, vector<2x8x8xbf16>, vector<2x8x8xf32> -> vector<2x8x8xf32>
    "tpu.trace_stop"() : () -> ()
    %c2_98 = arith.constant 2 : index
    %c0_99 = arith.constant 0 : index
    %c0_100 = arith.constant 0 : index
    %165 = vector.load %arg6[%c2_98, %c0_99, %c0_100] : memref<4x8x32xf32, #tpu.memory_space<vmem>>, vector<1x8x32xf32>
    %166 = vector.shape_cast %165 : vector<1x8x32xf32> to vector<8x32xf32>
    %167 = arith.truncf %166 : vector<8x32xf32> to vector<8x32xbf16>
    %168 = vector.shape_cast %164 : vector<2x8x8xf32> to vector<16x8xf32>
    %169 = arith.truncf %168 : vector<16x8xf32> to vector<16x8xbf16>
    %cst_101 = arith.constant dense<0.000000e+00> : vector<16x32xf32>
    %170 = tpu.matmul %169, %167, %cst_101 {dimension_numbers = #tpu.dot_dimension_numbers<[1], [0], [0], [1], [0, 0, 1, 1], [], []>} : vector<16x8xbf16>, vector<8x32xbf16>, vector<16x32xf32> -> vector<16x32xf32>
    %171 = arith.addf %116, %170 : vector<16x32xf32>
    %c0_102 = arith.constant 0 : index
    %c3 = arith.constant 3 : index
    %c0_103 = arith.constant 0 : index
    %c0_104 = arith.constant 0 : index
    %172 = vector.load %arg4[%c0_102, %c3, %c0_103, %c0_104] : memref<3x4x32x8xf32, #tpu.memory_space<vmem>>, vector<1x1x32x8xf32>
    %173 = vector.shape_cast %172 : vector<1x1x32x8xf32> to vector<32x8xf32>
    %174 = arith.truncf %173 : vector<32x8xf32> to vector<32x8xbf16>
    %c1_105 = arith.constant 1 : index
    %c3_106 = arith.constant 3 : index
    %c0_107 = arith.constant 0 : index
    %c0_108 = arith.constant 0 : index
    %175 = vector.load %arg4[%c1_105, %c3_106, %c0_107, %c0_108] : memref<3x4x32x8xf32, #tpu.memory_space<vmem>>, vector<1x1x32x8xf32>
    %176 = vector.shape_cast %175 : vector<1x1x32x8xf32> to vector<32x8xf32>
    %177 = arith.truncf %176 : vector<32x8xf32> to vector<32x8xbf16>
    %c2_109 = arith.constant 2 : index
    %c3_110 = arith.constant 3 : index
    %c0_111 = arith.constant 0 : index
    %c0_112 = arith.constant 0 : index
    %178 = vector.load %arg4[%c2_109, %c3_110, %c0_111, %c0_112] : memref<3x4x32x8xf32, #tpu.memory_space<vmem>>, vector<1x1x32x8xf32>
    %179 = vector.shape_cast %178 : vector<1x1x32x8xf32> to vector<32x8xf32>
    %180 = arith.truncf %179 : vector<32x8xf32> to vector<32x8xbf16>
    %c0_113 = arith.constant 0 : index
    %c3_114 = arith.constant 3 : index
    %c0_115 = arith.constant 0 : index
    %181 = vector.load %arg5[%c0_113, %c3_114, %c0_115] : memref<3x4x8xf32, #tpu.memory_space<vmem>>, vector<1x1x8xf32>
    %182 = vector.shape_cast %181 : vector<1x1x8xf32> to vector<8xf32>
    %c1_116 = arith.constant 1 : index
    %c3_117 = arith.constant 3 : index
    %c0_118 = arith.constant 0 : index
    %183 = vector.load %arg5[%c1_116, %c3_117, %c0_118] : memref<3x4x8xf32, #tpu.memory_space<vmem>>, vector<1x1x8xf32>
    %184 = vector.shape_cast %183 : vector<1x1x8xf32> to vector<8xf32>
    %c2_119 = arith.constant 2 : index
    %c3_120 = arith.constant 3 : index
    %c0_121 = arith.constant 0 : index
    %185 = vector.load %arg5[%c2_119, %c3_120, %c0_121] : memref<3x4x8xf32, #tpu.memory_space<vmem>>, vector<1x1x8xf32>
    %186 = vector.shape_cast %185 : vector<1x1x8xf32> to vector<8xf32>
    %cst_122 = arith.constant dense<0.000000e+00> : vector<16x8xf32>
    %187 = tpu.matmul %1, %174, %cst_122 {dimension_numbers = #tpu.dot_dimension_numbers<[1], [0], [0], [1], [0, 0, 1, 1], [], []>} : vector<16x32xbf16>, vector<32x8xbf16>, vector<16x8xf32> -> vector<16x8xf32>
    %188 = vector.shape_cast %182 : vector<8xf32> to vector<1x8xf32>
    %189 = vector.broadcast %188 : vector<1x8xf32> to vector<16x8xf32>
    %190 = arith.addf %187, %189 : vector<16x8xf32>
    %cst_123 = arith.constant 0.353553385 : f32
    %191 = vector.broadcast %cst_123 : f32 to vector<16x8xf32>
    %192 = arith.mulf %190, %191 : vector<16x8xf32>
    %cst_124 = arith.constant dense<0.000000e+00> : vector<16x8xf32>
    %193 = tpu.matmul %3, %177, %cst_124 {dimension_numbers = #tpu.dot_dimension_numbers<[1], [0], [0], [1], [0, 0, 1, 1], [], []>} : vector<16x32xbf16>, vector<32x8xbf16>, vector<16x8xf32> -> vector<16x8xf32>
    %194 = vector.shape_cast %184 : vector<8xf32> to vector<1x8xf32>
    %195 = vector.broadcast %194 : vector<1x8xf32> to vector<16x8xf32>
    %196 = arith.addf %193, %195 : vector<16x8xf32>
    %cst_125 = arith.constant dense<0.000000e+00> : vector<16x8xf32>
    %197 = tpu.matmul %5, %180, %cst_125 {dimension_numbers = #tpu.dot_dimension_numbers<[1], [0], [0], [1], [0, 0, 1, 1], [], []>} : vector<16x32xbf16>, vector<32x8xbf16>, vector<16x8xf32> -> vector<16x8xf32>
    %198 = vector.shape_cast %186 : vector<8xf32> to vector<1x8xf32>
    %199 = vector.broadcast %198 : vector<1x8xf32> to vector<16x8xf32>
    %200 = arith.addf %197, %199 : vector<16x8xf32>
    %201 = vector.shape_cast %192 : vector<16x8xf32> to vector<2x8x8xf32>
    %202 = arith.truncf %201 : vector<2x8x8xf32> to vector<2x8x8xbf16>
    %203 = vector.shape_cast %196 : vector<16x8xf32> to vector<2x8x8xf32>
    %204 = arith.truncf %203 : vector<2x8x8xf32> to vector<2x8x8xbf16>
    %205 = vector.shape_cast %200 : vector<16x8xf32> to vector<2x8x8xf32>
    %206 = arith.truncf %205 : vector<2x8x8xf32> to vector<2x8x8xbf16>
    "tpu.trace_start"() <{level = 10 : i32, message = "bqd,bkd->bqk"}> : () -> ()
    %cst_126 = arith.constant dense<0.000000e+00> : vector<2x8x8xf32>
    %207 = tpu.matmul %202, %204, %cst_126 {dimension_numbers = #tpu.dot_dimension_numbers<[2], [2], [1], [1], [0, 0, 0, 1, 1, 1], [0], [0]>} : vector<2x8x8xbf16>, vector<2x8x8xbf16>, vector<2x8x8xf32> -> vector<2x8x8xf32>
    "tpu.trace_stop"() : () -> ()
    %cst_127 = arith.constant dense<0xFF800000> : vector<2x8xf32>
    %208 = vector.multi_reduction <maximumf>, %207, %cst_127 [2] : vector<2x8x8xf32> to vector<2x8xf32>
    %209 = vector.shape_cast %208 : vector<2x8xf32> to vector<2x8x1xf32>
    %210 = vector.broadcast %209 : vector<2x8x1xf32> to vector<2x8x8xf32>
    %211 = arith.subf %207, %210 : vector<2x8x8xf32>
    %212 = math.exp %211 : vector<2x8x8xf32>
    %cst_128 = arith.constant dense<0.000000e+00> : vector<2x8xf32>
    %213 = vector.multi_reduction <add>, %212, %cst_128 [2] : vector<2x8x8xf32> to vector<2x8xf32>
    %214 = vector.shape_cast %213 : vector<2x8xf32> to vector<2x8x1xf32>
    %215 = tpu.reciprocal %214 {approx = true} : vector<2x8x1xf32> -> vector<2x8x1xf32>
    %216 = vector.broadcast %215 : vector<2x8x1xf32> to vector<2x8x8xf32>
    %217 = arith.mulf %212, %216 : vector<2x8x8xf32>
    %218 = arith.truncf %217 : vector<2x8x8xf32> to vector<2x8x8xbf16>
    "tpu.trace_start"() <{level = 10 : i32, message = "bqk,bkd->bqd"}> : () -> ()
    %cst_129 = arith.constant dense<0.000000e+00> : vector<2x8x8xf32>
    %219 = tpu.matmul %218, %206, %cst_129 {dimension_numbers = #tpu.dot_dimension_numbers<[2], [1], [1], [2], [0, 0, 0, 1, 1, 2], [0], [0]>} : vector<2x8x8xbf16>, vector<2x8x8xbf16>, vector<2x8x8xf32> -> vector<2x8x8xf32>
    "tpu.trace_stop"() : () -> ()
    %c3_130 = arith.constant 3 : index
    %c0_131 = arith.constant 0 : index
    %c0_132 = arith.constant 0 : index
    %220 = vector.load %arg6[%c3_130, %c0_131, %c0_132] : memref<4x8x32xf32, #tpu.memory_space<vmem>>, vector<1x8x32xf32>
    %221 = vector.shape_cast %220 : vector<1x8x32xf32> to vector<8x32xf32>
    %222 = arith.truncf %221 : vector<8x32xf32> to vector<8x32xbf16>
    %223 = vector.shape_cast %219 : vector<2x8x8xf32> to vector<16x8xf32>
    %224 = arith.truncf %223 : vector<16x8xf32> to vector<16x8xbf16>
    %cst_133 = arith.constant dense<0.000000e+00> : vector<16x32xf32>
    %225 = tpu.matmul %224, %222, %cst_133 {dimension_numbers = #tpu.dot_dimension_numbers<[1], [0], [0], [1], [0, 0, 1, 1], [], []>} : vector<16x8xbf16>, vector<8x32xbf16>, vector<16x32xf32> -> vector<16x32xf32>
    %226 = arith.addf %171, %225 : vector<16x32xf32>
    %c0_134 = arith.constant 0 : index
    %c0_135 = arith.constant 0 : index
    %227 = vector.load %arg7[%c0_134, %c0_135] : memref<1x32xf32, #tpu.memory_space<vmem>>, vector<1x32xf32>
    %228 = vector.broadcast %227 : vector<1x32xf32> to vector<16x32xf32>
    %229 = arith.addf %226, %228 : vector<16x32xf32>
    %c0_136 = arith.constant 0 : index
    %c0_137 = arith.constant 0 : index
    %230 = vector.load %arg8[%c0_136, %c0_137] : memref<16x32xf32, #tpu.memory_space<vmem>>, vector<16x32xf32>
    tpu.vector_store %arg8[%c0_136, %c0_137], %229 {strides = array<i32>} : memref<16x32xf32, #tpu.memory_space<vmem>>, vector<16x32xf32>,
    return
  }
  func.func @transform_0(%arg0: i32) -> (i32, i32) {
    %c0_i32 = arith.constant 0 : i32
    %c0_i32_0 = arith.constant 0 : i32
    %c0_i32_1 = arith.constant 0 : i32
    return %c0_i32, %c0_i32_0 : i32, i32
  }
  func.func @transform_1(%arg0: i32) -> (i32, i32) {
    %c0_i32 = arith.constant 0 : i32
    %c0_i32_0 = arith.constant 0 : i32
    %c0_i32_1 = arith.constant 0 : i32
    return %c0_i32, %c0_i32_0 : i32, i32
  }
  func.func @transform_2(%arg0: i32) -> (i32, i32) {
    %c0_i32 = arith.constant 0 : i32
    %c0_i32_0 = arith.constant 0 : i32
    %c0_i32_1 = arith.constant 0 : i32
    return %c0_i32, %c0_i32_0 : i32, i32
  }
  func.func @transform_3(%arg0: i32) -> (i32, i32, i32, i32) {
    %c0_i32 = arith.constant 0 : i32
    %c0_i32_0 = arith.constant 0 : i32
    %c0_i32_1 = arith.constant 0 : i32
    %c0_i32_2 = arith.constant 0 : i32
    %c0_i32_3 = arith.constant 0 : i32
    return %c0_i32, %c0_i32_0, %c0_i32_1, %c0_i32_2 : i32, i32, i32, i32
  }
  func.func @transform_4(%arg0: i32) -> (i32, i32, i32) {
    %c0_i32 = arith.constant 0 : i32
    %c0_i32_0 = arith.constant 0 : i32
    %c0_i32_1 = arith.constant 0 : i32
    %c0_i32_2 = arith.constant 0 : i32
    return %c0_i32, %c0_i32_0, %c0_i32_1 : i32, i32, i32
  }
  func.func @transform_5(%arg0: i32) -> (i32, i32, i32) {
    %c0_i32 = arith.constant 0 : i32
    %c0_i32_0 = arith.constant 0 : i32
    %c0_i32_1 = arith.constant 0 : i32
    %c0_i32_2 = arith.constant 0 : i32
    return %c0_i32, %c0_i32_0, %c0_i32_1 : i32, i32, i32
  }
  func.func @transform_6(%arg0: i32) -> (i32, i32) {
    %c0_i32 = arith.constant 0 : i32
    %c0_i32_0 = arith.constant 0 : i32
    %c0_i32_1 = arith.constant 0 : i32
    return %c0_i32, %c0_i32_0 : i32, i32
  }
  func.func @transform_7(%arg0: i32) -> (i32, i32) {
    %c0_i32 = arith.constant 0 : i32
    %c0_i32_0 = arith.constant 0 : i32
    %c0_i32_1 = arith.constant 0 : i32
    return %c0_i32, %c0_i32_0 : i32, i32
  }
}

</mosaic_0001>

<bundles_post_ra>
// kernel: tpu_custom_call.1
= control target key start
LH: loop header
LB: loop body
LE: loop exit
PB: predicated region body
PF: predicated region fallthrough
CT: control target
= control target key end

     0   :  { %v2237_v3 = vmov 0.0   ;;  %vm2238_vm0 = vmmov 0   ;;  %s2724_s0 = inlined_call_operand.vmem [shape: f32[16,32], index: 0, kind: input, shape index: {}]   ;;  %s2725_s1 = inlined_call_operand.vmem [shape: f32[16,32], index: 1, kind: input, shape index: {}]   ;;  %s2726_s2 = inlined_call_operand.vmem [shape: f32[16,32], index: 2, kind: input, shape index: {}]   ;;  %s2727_s3 = inlined_call_operand.vmem [shape: f32[3,4,32,8], index: 3, kind: input, shape index: {}]   ;;  %s2728_s4 = inlined_call_operand.vmem [shape: f32[3,4,8], index: 4, kind: input, shape index: {}]   ;;  %s2729_s5 = inlined_call_operand.vmem [shape: f32[4,8,32], index: 5, kind: input, shape index: {}]   ;;  %s2730_s6 = inlined_call_operand.vmem [shape: f32[1,32], index: 6, kind: input, shape index: {}]   ;;  %s2731_s7 = inlined_call_operand.hbm [shape: f32[16,32], index: 7, kind: output, shape index: {}]  }
   0x1   :  { %v1784_v0 = vld [vmem:[%s2727_s3 + $0x80] sm:$0xff]  ;;  %v1785_v1 = vld [vmem:[%s2727_s3 + $0x88] sm:$0xff]  ;;  %1968 = vmatprep.subr.bf16.mxu1 %v2237_v3  ;;  %1960 = vmatprep.subr.bf16.mxu0 %v2237_v3  ;;  %v1786_v6 = vld [vmem:[%s2727_s3 + $0x90] sm:$0xff] }
   0x2   :  { %v37_v2 = vld [vmem:[%s2727_s3] sm:$0xff]  ;;  %v48_v4 = vpack.c.bf16 %v1785_v1, %v1784_v0  ;;  %v38_v5 = vld [vmem:[%s2727_s3 + $0x8] sm:$0xff]  ;;  %v1787_v7 = vld [vmem:[%s2727_s3 + $0x98] sm:$0xff]  ;;  %1972 = vmatprep.mubr.msk.bf16.mxu1 %vm2238_vm0, %v2237_v3  ;;  %1964 = vmatprep.mubr.msk.bf16.mxu0 %vm2238_vm0, %v2237_v3 }
   0x3   :  { %v41_v8 = vpack.c.bf16 %v38_v5, %v37_v2  ;;  %v39_v9 = vld [vmem:[%s2727_s3 + $0x10] sm:$0xff]  ;;  %v40_v10 = vld [vmem:[%s2727_s3 + $0x18] sm:$0xff]  ;;  %v49_v11 = vpack.c.bf16 %v1787_v7, %v1786_v6  ;;  %v31_v12 = vld [vmem:[%s2725_s1] sm:$0xff] }
   0x4   :  { %1969 = vmatpush3.bf16.msra.mxu1 %v48_v4  ;;  %v32_v13 = vld [vmem:[%s2725_s1 + $0x8] sm:$0xff]  ;;  %v42_v14 = vpack.c.bf16 %v40_v10, %v39_v9  ;;  %v28_v15 = vld [vmem:[%s2724_s0] sm:$0xff] }
   0x5   :  { %1961 = vmatpush3.bf16.msra.mxu0 %v41_v8  ;;  %1970 = vmatprep.subr.bf16.mxu1 %v2237_v3  ;;  %v29_v16 = vld [vmem:[%s2724_s0 + $0x8] sm:$0xff]  ;;  %v1788_v17 = vld [vmem:[%s2727_s3 + $0x100] sm:$0xff] }
   0x6   :  { %1962 = vmatprep.subr.bf16.mxu0 %v2237_v3  ;;  %v1789_v18 = vld [vmem:[%s2727_s3 + $0x108] sm:$0xff] }
   0x7   :  { %12 = vsyncpa [#allocation3], 0  ;;  %v2332_v19 = vpack.c.bf16 %v32_v13, %v31_v12  ;;  %vm66_vm1 = vcmask 261120   ;;  %v2334_v20 = vpack.c.bf16 %v29_v16, %v28_v15  ;;  %v55_v21 = vpack.c.bf16 %v1789_v18, %v1788_v17  ;;  %v1790_v22 = vld [vmem:[%s2727_s3 + $0x110] sm:$0xff]  ;;  %v1791_v23 = vld [vmem:[%s2727_s3 + $0x118] sm:$0xff]  ;;  %s2239_s11 = smov [#allocation2]  }
   0x8   :  { %1971 = vmatpush3.bf16.msra.mxu1 %v49_v11  ;;  %v56_v24 = vpack.c.bf16 %v1791_v23, %v1790_v22  ;;  %v34_v25 = vld [vmem:[%s2726_s2] sm:$0xff]  ;;  %v35_v26 = vld [vmem:[%s2726_s2 + $0x8] sm:$0xff]  ;;  %vm215_vm2 = vcmask 64512   ;;  %vm335_vm3 = vcmask 1043456   ;;  %s1773_s12 = sshll.u32 %s2239_s11, 4  ;;  %s1774_s12 = int_to_ptr.vmem [resolvable:$true] %s1773_s12 }
   0x9   :  { %1963 = vmatpush3.bf16.msra.mxu0 %v42_v14  ;;  %1984 = vmatprep.subr.bf16.mxu1 %v2237_v3  ;;  %v2360_v27 = vpack.c.bf16 %v35_v26, %v34_v25  ;;  %v1796_v28 = vld [vmem:[%s2728_s4 + $0x4] ss:$0 sm:$0xff]  ;;  %v1794_v29 = vld [vmem:[%s2728_s4] ss:$0 sm:$0xff]  ;;  %v1798_v50 = vld [vmem:[%s2728_s4 + $0x8] ss:$0 sm:$0xff]  ;;  %p2218_p1 = scmp.lt.s32.totalorder %s1774_s12, %s1774_s12 }
   0xa   :  { %1976 = vmatprep.subr.bf16.mxu0 %v2237_v3  ;;  %v1808_v22 = vld [vmem:[%s2727_s3 + $0xa0] sm:$0xff]  ;;  %v1809_v23 = vld [vmem:[%s2727_s3 + $0xa8] sm:$0xff]  ;;  %s2213_s13 = scalar_lea.vmem %s1774_s12, 256 }
   0xb   :  { %1973 = vmatmul.mubr.msk.bf16.vlgmr.msra.gmra.mrb[0].mxu1 %vm66_vm1, %v2332_v19  ;;  %v440_v26 = vpack.c.bf16 %v1809_v23, %v1808_v22  ;;  %p2214_p0 = scmp.ne.s32.totalorder %s1774_s12, %s2213_s13  ;;  %p2219_p2 = scmp.lt.s32.totalorder %s2213_s13, %s2213_s13 }
   0xc   :  { %1965 = vmatmul.mubr.msk.bf16.vlgmr.msra.gmra.mrb[0].mxu0 %vm66_vm1, %v2334_v20  ;;  %1986 = vmatprep.mubr.msk.bf16.mxu1 %vm2238_vm0, %v2237_v3 }
   0xd   :  { %1977 = vmatpush3.bf16.msra.mxu0 %v55_v21  ;;  %1980 = vmatprep.mubr.msk.bf16.mxu0 %vm2238_vm0, %v2237_v3  ;;  %p2220_p3 = por %p2219_p2, %p2218_p1 }
   0xe   :  { %1978 = vmatprep.subr.bf16.mxu0 %v2237_v3 }
   0xf   :  { %p2221_p4 = pnand %p2220_p3, %p2214_p0 }
  0x11   :  { %1979 = vmatpush3.bf16.msra.mxu0 %v56_v24 }
  0x12   :  { %1990 = vmatprep.subr.bf16.mxu0 %v2237_v3 }
  0x14   :  { %1981 = vmatmul.mubr.msk.bf16.vlgmr.msra.gmra.mrb[4].mxu0 %vm66_vm1, %v2360_v27 }
  0x15   :  { %1992 = vmatprep.mubr.msk.bf16.mxu0 %vm2238_vm0, %v2237_v3 }
  0xde   :  { %v154_v30 = vpop.f32.mrb[0].mxu1 }
  0xdf   :  { %v155_v31 = vadd.f32 %v1796_v28, %v154_v30  ;;  %v1974_v32 = vpop.f32.mrb[1].mxu1  ;;  %v104_v33 = vpop.f32.mrb[0].mxu0  ;;  %v1805_v30 = vld [vmem:[%s2727_s3 + $0x28] sm:$0xff] }
  0xe0   :  { %v157_v34 = vpop.f32.mrb[2].mxu1  ;;  %v105_v35 = vadd.f32 %v1794_v29, %v104_v33  ;;  %v1966_v36 = vpop.f32.mrb[1].mxu0  ;;  %v1811_v32 = vld [vmem:[%s2727_s3 + $0xb8] sm:$0xff] }
  0xe1   :  { %v211_v37 = vpack.c.bf16 %v155_v31, %v155_v31  ;;  %v158_v38 = vadd.f32 %v1796_v28, %v157_v34  ;;  %v1975_v39 = vpop.f32.mrb[3].mxu1  ;;  %v107_v40 = vpop.f32.mrb[2].mxu0  ;;  %v1804_v28 = vld [vmem:[%s2727_s3 + $0x20] sm:$0xff]  ;;  %v1810_v31 = vld [vmem:[%s2727_s3 + $0xb0] sm:$0xff] }
  0xe2   :  { %v1967_v41 = vpop.f32.mrb[3].mxu0  ;;  %v111_v44 = vmul.f32 0.35355338, %v105_v35  ;;  %v108_v45 = vadd.f32 %v1794_v29, %v107_v40  ;;  %v433_v35 = vpack.c.bf16 %v1805_v30, %v1804_v28  ;;  %v441_v36 = vpack.c.bf16 %v1811_v32, %v1810_v31  ;;  %v1807_v39 = vld [vmem:[%s2727_s3 + $0x38] sm:$0xff] }
  0xe3   :  { %v220_v42 = vsel %vm215_vm2, %v211_v37, 0  ;;  %v212_v43 = vpack.c.bf16 %v158_v38, %v158_v38  ;;  %v1806_v38 = vld [vmem:[%s2727_s3 + $0x30] sm:$0xff]  ;;  %v1812_v41 = vld [vmem:[%s2727_s3 + $0x120] sm:$0xff] }
  0xe4   :  { %1985 = vmatpush3.bf16.xpose.msra.mxu1 %v220_v42  ;;  %v209_v47 = vpack.c.bf16 %v111_v44, %v111_v44  ;;  %v112_v48 = vmul.f32 0.35355338, %v108_v45  ;;  %v434_v40 = vpack.c.bf16 %v1807_v39, %v1806_v38  ;;  %v1813_v42 = vld [vmem:[%s2727_s3 + $0x128] sm:$0xff]  ;;  %v1814_v44 = vld [vmem:[%s2727_s3 + $0x130] sm:$0xff]  ;;  %v1815_v45 = vld [vmem:[%s2727_s3 + $0x138] sm:$0xff] }
  0xe5   :  { %v266_v46 = vsel %vm215_vm2, %v212_v43, 0  ;;  %1996 = vmatprep.subr.bf16.mxu1 %v2237_v3  ;;  %v447_v43 = vpack.c.bf16 %v1813_v42, %v1812_v41 }
  0xe6   :  { %1991 = vmatpush3.bf16.xpose.msra.mxu0 %v266_v46  ;;  %v210_v49 = vpack.c.bf16 %v112_v48, %v112_v48  ;;  %v448_v46 = vpack.c.bf16 %v1815_v45, %v1814_v44 }
  0xe7   :  { %2002 = vmatprep.subr.bf16.mxu0 %v2237_v3  ;;  %v202_v51 = vpop.f32.mrb[4].mxu0 }
  0xe8   :  { %v203_v52 = vadd.f32 %v1798_v50, %v202_v51  ;;  %v1982_v53 = vpop.f32.mrb[5].mxu0 }
  0xe9   :  { %v205_v54 = vpop.f32.mrb[6].mxu0 }
  0xea   :  { %v213_v55 = vpack.c.bf16 %v203_v52, %v203_v52  ;;  %v206_v56 = vadd.f32 %v1798_v50, %v205_v54  ;;  %v1983_v57 = vpop.f32.mrb[7].mxu0 }
  0xeb   :  { %1987 = vmatmul.mubr.msk.bf16.vlgmr.msra.gmra.mrb[4].mxu1 %vm215_vm2, %v209_v47 }
  0xec   :  { %1998 = vmatprep.mubr.msk.bf16.mxu1 %vm2238_vm0, %v2237_v3  ;;  %v337_v58 = vsel %vm335_vm3, %v213_v55, 0  ;;  %v214_v59 = vpack.c.bf16 %v206_v56, %v206_v56  ;;  %v1820_v55 = vld [vmem:[%s2728_s4 + $0x5] ss:$0 sm:$0xff] }
  0xed   :  { %1993 = vmatmul.mubr.msk.bf16.vlgmr.msra.gmra.mrb[8].mxu0 %vm215_vm2, %v210_v49  ;;  %1997 = vmatpush3.bf16.msra.mxu1 %v337_v58 }
  0xee   :  { %2004 = vmatprep.mubr.msk.bf16.mxu0 %vm2238_vm0, %v2237_v3  ;;  %v383_v60 = vsel %vm335_vm3, %v214_v59, 0  ;;  %2008 = vmatprep.subr.bf16.mxu1 %v2237_v3 }
  0xef   :  { %2003 = vmatpush3.bf16.msra.mxu0 %v383_v60 }
  0xf0   :  { %2016 = vmatprep.subr.bf16.mxu0 %v2237_v3 }
 0x1be   :  { %v256_v61 = vpop.f32.mrb[4].mxu1 }
 0x1bf   :  { %v1988_v62 = vpop.f32.mrb[5].mxu1  ;;  %v308_v7 = vsel %vm215_vm2, %v256_v61, -inf }
 0x1c0   :  { %v259_v63 = vpop.f32.mrb[6].mxu1  ;;  %v302_v0 = vpop.f32.mrb[8].mxu0 }
 0x1c1   :  { %v1989_v1 = vpop.f32.mrb[7].mxu1  ;;  %v1994_v2 = vpop.f32.mrb[9].mxu0  ;;  %v311_v4 = vsel %vm215_vm2, %v302_v0, -inf }
 0x1c2   :  { %312 = vmax.xlane.f32.xlu0 %v311_v4  ;;  %v305_v5 = vpop.f32.mrb[10].mxu0 }
 0x1c3   :  { %v1995_v6 = vpop.f32.mrb[11].mxu0 }
 0x1c6   :  { %309 = vmax.xlane.f32.xlu0 %v308_v7 }
 0x24f   :  { %v313_v8 = vpop.xlane.xlu0 %312 }
 0x250   :  { %v315_v9 = vsub.f32 %v302_v0, %v313_v8 }
 0x252   :  { %v318_v10 = vmul.f32 1.442695, %v315_v9 }
 0x253   :  { %v310_v11 = vpop.xlane.xlu0 %309 }
 0x254   :  { %2181 = vpow2.f32 %v318_v10  ;;  %v314_v12 = vsub.f32 %v256_v61, %v310_v11  ;;  %v1818_v61 = vld [vmem:[%s2728_s4 + $0x1] ss:$0 sm:$0xff] }
 0x256   :  { %v316_v13 = vmul.f32 1.442695, %v314_v12 }
 0x258   :  { %2183 = vpow2.f32 %v316_v13 }
 0x25e   :  { %v2182_v14 = vpop.eup %2181 }
 0x25f   :  { %v323_v15 = vsel %vm215_vm2, %v2182_v14, 0.0 }
 0x260   :  { %324 = vadd.xlane.f32.xlu1 %v323_v15  ;;  %v1822_v15 = vld [vmem:[%s2728_s4 + $0x9] ss:$0 sm:$0xff] }
 0x262   :  { %v2184_v16 = vpop.eup %2183 }
 0x263   :  { %v320_v17 = vsel %vm215_vm2, %v2184_v16, 0.0 }
 0x264   :  { %321 = vadd.xlane.f32.xlu1 %v320_v17 }
 0x2ed   :  { %v325_v18 = vpop.xlane.xlu1 %324 }
 0x2ee   :  { %2185 = vrcp.f32 %v325_v18 }
 0x2f1   :  { %v322_v21 = vpop.xlane.xlu1 %321 }
 0x2f2   :  { %2187 = vrcp.f32 %v322_v21 }
 0x2f8   :  { %v2186_v24 = vpop.eup %2185 }
 0x2f9   :  { %v329_v25 = vmul.f32 %v2186_v24, %v2182_v14 }
 0x2fb   :  { %v331_v29 = vpack.c.bf16 %v329_v25, %v329_v25 }
 0x2fc   :  { %v2188_v33 = vpop.eup %2187 }
 0x2fd   :  { %v328_v34 = vmul.f32 %v2188_v33, %v2184_v16  ;;  %2005 = vmatmul.mubr.msk.bf16.vlgmr.msra.gmra.mrb[12].mxu0 %vm215_vm2, %v331_v29 }
 0x2fe   :  { %2017 = vmatpush3.bf16.msra.mxu0 %v440_v26  ;;  %2020 = vmatprep.mubr.msk.bf16.mxu0 %vm2238_vm0, %v2237_v3 }
 0x2ff   :  { %v330_v37 = vpack.c.bf16 %v328_v34, %v328_v34  ;;  %2018 = vmatprep.subr.bf16.mxu0 %v2237_v3 }
 0x301   :  { %1999 = vmatmul.mubr.msk.bf16.vlgmr.msra.gmra.mrb[8].mxu1 %vm215_vm2, %v330_v37 }
 0x302   :  { %2009 = vmatpush3.bf16.msra.mxu1 %v433_v35  ;;  %2019 = vmatpush3.bf16.msra.mxu0 %v441_v36 }
 0x303   :  { %2010 = vmatprep.subr.bf16.mxu1 %v2237_v3  ;;  %2012 = vmatprep.mubr.msk.bf16.mxu1 %vm2238_vm0, %v2237_v3 }
 0x304   :  { %2032 = vmatprep.subr.bf16.mxu0 %v2237_v3 }
 0x305   :  { %2021 = vmatmul.mubr.msk.bf16.vlgmr.msra.gmra.mrb[16].mxu0 %vm66_vm1, %v2332_v19 }
 0x306   :  { %2011 = vmatpush3.bf16.msra.mxu1 %v434_v40  ;;  %2034 = vmatprep.mubr.msk.bf16.mxu0 %vm2238_vm0, %v2237_v3 }
 0x307   :  { %2024 = vmatprep.subr.bf16.mxu1 %v2237_v3 }
 0x309   :  { %2013 = vmatmul.mubr.msk.bf16.vlgmr.msra.gmra.mrb[12].mxu1 %vm66_vm1, %v2334_v20 }
 0x30a   :  { %2028 = vmatprep.mubr.msk.bf16.mxu1 %vm2238_vm0, %v2237_v3  ;;  %2025 = vmatpush3.bf16.msra.mxu1 %v447_v43 }
 0x30b   :  { %2026 = vmatprep.subr.bf16.mxu1 %v2237_v3 }
 0x30e   :  { %2027 = vmatpush3.bf16.msra.mxu1 %v448_v46 }
 0x30f   :  { %2038 = vmatprep.subr.bf16.mxu1 %v2237_v3 }
 0x311   :  { %2029 = vmatmul.mubr.msk.bf16.vlgmr.msra.gmra.mrb[16].mxu1 %vm66_vm1, %v2360_v27 }
 0x312   :  { %2040 = vmatprep.mubr.msk.bf16.mxu1 %vm2238_vm0, %v2237_v3 }
 0x3d0   :  { %v2453_v47 = vpop.f32.mrb[12].mxu0 }
 0x3d1   :  { %v2006_v48 = vpop.f32.mrb[13].mxu0 }
 0x3d2   :  { %v422_v49 = vpop.f32.mrb[14].mxu0 }
 0x3d3   :  { %v2007_v50 = vpop.f32.mrb[15].mxu0 }
 0x3d4   :  { %v2455_v51 = vpop.f32.mrb[8].mxu1 }
 0x3d5   :  { %v427_v52 = vpack.c.bf16 %v2453_v47, %v2455_v51  ;;  %v2000_v53 = vpop.f32.mrb[9].mxu1  ;;  %v1831_v47 = vld [vmem:[%s2727_s3 + $0x40] sm:$0xff]  ;;  %v1832_v51 = vld [vmem:[%s2727_s3 + $0x48] sm:$0xff] }
 0x3d6   :  { %v376_v54 = vpop.f32.mrb[10].mxu1 }
 0x3d7   :  { %v2001_v56 = vpop.f32.mrb[11].mxu1  ;;  %v1828_v54 = vld [vmem:[%s2729_s5 + $0x8] sm:$0xff] }
 0x3d8   :  { %v537_v57 = vpop.f32.mrb[16].mxu0  ;;  %v805_v56 = vpack.c.bf16 %v1828_v54, %v1828_v54  ;;  %v1845_v54 = vld [vmem:[%s2728_s4 + $0x2] ss:$0 sm:$0xff] }
 0x3d9   :  { %v538_v58 = vadd.f32 %v1820_v55, %v537_v57  ;;  %v2022_v59 = vpop.f32.mrb[17].mxu0 }
 0x3da   :  { %v540_v60 = vpop.f32.mrb[18].mxu0 }
 0x3db   :  { %v591_v62 = vpack.c.bf16 %v538_v58, %v538_v58  ;;  %v541_v63 = vadd.f32 %v1820_v55, %v540_v60  ;;  %v2023_v0 = vpop.f32.mrb[19].mxu0  ;;  %v425_v55 = vld [vmem:[%s2729_s5] sm:$0xff] }
 0x3dc   :  { %v490_v1 = vpop.f32.mrb[12].mxu1  ;;  %v426_v59 = vpack.c.bf16 %v425_v55, %v425_v55 }
 0x3dd   :  { %v599_v2 = vsel %vm215_vm2, %v591_v62, 0  ;;  %v592_v4 = vpack.c.bf16 %v541_v63, %v541_v63  ;;  %v491_v5 = vadd.f32 %v1818_v61, %v490_v1  ;;  %v2014_v6 = vpop.f32.mrb[13].mxu1  ;;  %v811_v63 = vsel %vm335_vm3, %v805_v56, 0 }
 0x3de   :  { %v493_v7 = vpop.f32.mrb[14].mxu1  ;;  %2033 = vmatpush3.bf16.xpose.msra.mxu0 %v599_v2  ;;  %v858_v1 = vsel %vm335_vm3, %v426_v59, 0  ;;  %v1835_v2 = vld [vmem:[%s2727_s3 + $0xc0] sm:$0xff]  ;;  %v1837_v6 = vld [vmem:[%s2727_s3 + $0xd0] sm:$0xff] }
 0x3df   :  { %v645_v8 = vsel %vm215_vm2, %v592_v4, 0  ;;  %v497_v9 = vmul.f32 0.35355338, %v491_v5  ;;  %v494_v10 = vadd.f32 %v1818_v61, %v493_v7  ;;  %v2015_v11 = vpop.f32.mrb[15].mxu1  ;;  %2044 = vmatprep.subr.bf16.mxu0 %v2237_v3  ;;  %v1836_v4 = vld [vmem:[%s2727_s3 + $0xc8] sm:$0xff]  ;;  %v1838_v7 = vld [vmem:[%s2727_s3 + $0xd8] sm:$0xff] }
 0x3e0   :  { %2039 = vmatpush3.bf16.xpose.msra.mxu1 %v645_v8  ;;  %v913_v5 = vpack.c.bf16 %v1836_v4, %v1835_v2  ;;  %v914_v8 = vpack.c.bf16 %v1838_v7, %v1837_v6 }
 0x3e1   :  { %v589_v12 = vpack.c.bf16 %v497_v9, %v497_v9  ;;  %v498_v13 = vmul.f32 0.35355338, %v494_v10  ;;  %2050 = vmatprep.subr.bf16.mxu1 %v2237_v3 }
 0x3e3   :  { %v590_v14 = vpack.c.bf16 %v498_v13, %v498_v13 }
 0x3e4   :  { %v582_v16 = vpop.f32.mrb[16].mxu1 }
 0x3e5   :  { %2035 = vmatmul.mubr.msk.bf16.vlgmr.msra.gmra.mrb[20].mxu0 %vm215_vm2, %v589_v12  ;;  %v583_v17 = vadd.f32 %v1822_v15, %v582_v16  ;;  %v2030_v18 = vpop.f32.mrb[17].mxu1  ;;  %v906_v12 = vpack.c.bf16 %v1832_v51, %v1831_v47  ;;  %v1833_v16 = vld [vmem:[%s2727_s3 + $0x50] sm:$0xff] }
 0x3e6   :  { %2046 = vmatprep.mubr.msk.bf16.mxu0 %vm2238_vm0, %v2237_v3  ;;  %v585_v21 = vpop.f32.mrb[18].mxu1 }
 0x3e7   :  { %2041 = vmatmul.mubr.msk.bf16.vlgmr.msra.gmra.mrb[20].mxu1 %vm215_vm2, %v590_v14  ;;  %v593_v22 = vpack.c.bf16 %v583_v17, %v583_v17  ;;  %v586_v23 = vadd.f32 %v1822_v15, %v585_v21  ;;  %v2031_v24 = vpop.f32.mrb[19].mxu1  ;;  %v1834_v17 = vld [vmem:[%s2727_s3 + $0x58] sm:$0xff] }
 0x3e8   :  { %2052 = vmatprep.mubr.msk.bf16.mxu1 %vm2238_vm0, %v2237_v3  ;;  %v1840_v24 = vld [vmem:[%s2727_s3 + $0x148] sm:$0xff] }
 0x3e9   :  { %v715_v25 = vsel %vm335_vm3, %v593_v22, 0  ;;  %v594_v26 = vpack.c.bf16 %v586_v23, %v586_v23  ;;  %v907_v22 = vpack.c.bf16 %v1834_v17, %v1833_v16  ;;  %v1839_v23 = vld [vmem:[%s2727_s3 + $0x140] sm:$0xff] }
 0x3ea   :  { %2045 = vmatpush3.bf16.msra.mxu0 %v715_v25 }
 0x3eb   :  { %v761_v28 = vsel %vm335_vm3, %v594_v26, 0  ;;  %2056 = vmatprep.subr.bf16.mxu0 %v2237_v3  ;;  %v920_v26 = vpack.c.bf16 %v1840_v24, %v1839_v23 }
 0x3ec   :  { %2051 = vmatpush3.bf16.msra.mxu1 %v761_v28 }
 0x3ed   :  { %2062 = vmatprep.subr.bf16.mxu1 %v2237_v3 }
 0x4b8   :  { %v635_v29 = vpop.f32.mrb[20].mxu0 }
 0x4b9   :  { %v2036_v30 = vpop.f32.mrb[21].mxu0  ;;  %v687_v31 = vsel %vm215_vm2, %v635_v29, -inf }
 0x4ba   :  { %v681_v32 = vpop.f32.mrb[20].mxu1  ;;  %688 = vmax.xlane.f32.xlu0 %v687_v31  ;;  %v638_v33 = vpop.f32.mrb[22].mxu0  ;;  %v1842_v30 = vld [vmem:[%s2727_s3 + $0x158] sm:$0xff] }
 0x4bb   :  { %v2037_v34 = vpop.f32.mrb[23].mxu0  ;;  %v2042_v35 = vpop.f32.mrb[21].mxu1  ;;  %v690_v36 = vsel %vm215_vm2, %v681_v32, -inf }
 0x4bc   :  { %691 = vmax.xlane.f32.xlu1 %v690_v36  ;;  %v684_v37 = vpop.f32.mrb[22].mxu1  ;;  %v1847_v34 = vld [vmem:[%s2728_s4 + $0x6] ss:$0 sm:$0xff] }
 0x4bd   :  { %v2043_v38 = vpop.f32.mrb[23].mxu1 }
 0x547   :  { %v689_v39 = vpop.xlane.xlu0 %688 }
 0x548   :  { %v693_v40 = vsub.f32 %v635_v29, %v689_v39  ;;  %v1841_v29 = vld [vmem:[%s2727_s3 + $0x150] sm:$0xff] }
 0x549   :  { %v692_v41 = vpop.xlane.xlu1 %691  ;;  %v921_v33 = vpack.c.bf16 %v1842_v30, %v1841_v29 }
 0x54a   :  { %v695_v42 = vmul.f32 1.442695, %v693_v40  ;;  %v694_v43 = vsub.f32 %v681_v32, %v692_v41 }
 0x54c   :  { %2189 = vpow2.f32 %v695_v42  ;;  %v697_v44 = vmul.f32 1.442695, %v694_v43 }
 0x54e   :  { %2191 = vpow2.f32 %v697_v44 }
 0x556   :  { %v2190_v45 = vpop.eup %2189 }
 0x557   :  { %v699_v46 = vsel %vm215_vm2, %v2190_v45, 0.0 }
 0x558   :  { %v2192_v48 = vpop.eup %2191  ;;  %700 = vadd.xlane.f32.xlu0 %v699_v46 }
 0x559   :  { %v702_v49 = vsel %vm215_vm2, %v2192_v48, 0.0 }
 0x55a   :  { %703 = vadd.xlane.f32.xlu1 %v702_v49 }
 0x5e5   :  { %v701_v50 = vpop.xlane.xlu0 %700 }
 0x5e6   :  { %2193 = vrcp.f32 %v701_v50 }
 0x5e7   :  { %v704_v53 = vpop.xlane.xlu1 %703 }
 0x5e8   :  { %2195 = vrcp.f32 %v704_v53 }
 0x5f0   :  { %v2194_v57 = vpop.eup %2193 }
 0x5f1   :  { %v707_v58 = vmul.f32 %v2194_v57, %v2190_v45 }
 0x5f2   :  { %v2196_v60 = vpop.eup %2195 }
 0x5f3   :  { %v708_v61 = vmul.f32 %v2196_v60, %v2192_v48  ;;  %v709_v62 = vpack.c.bf16 %v707_v58, %v707_v58 }
 0x5f5   :  { %2047 = vmatmul.mubr.msk.bf16.vlgmr.msra.gmra.mrb[24].mxu0 %vm215_vm2, %v709_v62  ;;  %v710_v0 = vpack.c.bf16 %v708_v61, %v708_v61 }
 0x5f6   :  { %2057 = vmatpush3.bf16.msra.mxu0 %v811_v63  ;;  %2058 = vmatprep.mubr.msk.bf16.mxu0 %vm2238_vm0, %v2237_v3 }
 0x5f7   :  { %2053 = vmatmul.mubr.msk.bf16.vlgmr.msra.gmra.mrb[24].mxu1 %vm215_vm2, %v710_v0  ;;  %2068 = vmatprep.subr.bf16.mxu0 %v2237_v3  ;;  %v1849_v0 = vld [vmem:[%s2728_s4 + $0xa] ss:$0 sm:$0xff] }
 0x5f8   :  { %2063 = vmatpush3.bf16.msra.mxu1 %v858_v1  ;;  %2064 = vmatprep.mubr.msk.bf16.mxu1 %vm2238_vm0, %v2237_v3 }
 0x5f9   :  { %2076 = vmatprep.subr.bf16.mxu1 %v2237_v3 }
 0x5ff   :  { %2065 = vmatmul.mubr.msk.bf16.vlgmr.msra.gmra.mrb[28].mxu1 %vm215_vm2, %v427_v52 }
 0x600   :  { %2077 = vmatpush3.bf16.msra.mxu1 %v913_v5  ;;  %2080 = vmatprep.mubr.msk.bf16.mxu1 %vm2238_vm0, %v2237_v3 }
 0x601   :  { %2078 = vmatprep.subr.bf16.mxu1 %v2237_v3 }
 0x604   :  { %2079 = vmatpush3.bf16.msra.mxu1 %v914_v8 }
 0x605   :  { %2092 = vmatprep.subr.bf16.mxu1 %v2237_v3 }
 0x607   :  { %2081 = vmatmul.mubr.msk.bf16.vlgmr.msra.gmra.mrb[32].mxu1 %vm66_vm1, %v2332_v19 }
 0x608   :  { %2094 = vmatprep.mubr.msk.bf16.mxu1 %vm2238_vm0, %v2237_v3 }
 0x6c8   :  { %v751_v52 = vpop.f32.mrb[24].mxu0 }
 0x6c9   :  { %v2048_v9 = vpop.f32.mrb[25].mxu0 }
 0x6ca   :  { %v754_v10 = vpop.f32.mrb[26].mxu0  ;;  %v797_v11 = vpop.f32.mrb[24].mxu1 }
 0x6cb   :  { %v806_v13 = vpack.c.bf16 %v797_v11, %v751_v52  ;;  %v2049_v14 = vpop.f32.mrb[27].mxu0  ;;  %v2054_v15 = vpop.f32.mrb[25].mxu1 }
 0x6cc   :  { %v800_v18 = vpop.f32.mrb[26].mxu1 }
 0x6cd   :  { %v2055_v21 = vpop.f32.mrb[27].mxu1  ;;  %2059 = vmatmul.mubr.msk.bf16.vlgmr.msra.gmra.mrb[28].mxu0 %vm215_vm2, %v806_v13 }
 0x6ce   :  { %2069 = vmatpush3.bf16.msra.mxu0 %v906_v12  ;;  %2072 = vmatprep.mubr.msk.bf16.mxu0 %vm2238_vm0, %v2237_v3 }
 0x6cf   :  { %2070 = vmatprep.subr.bf16.mxu0 %v2237_v3 }
 0x6d2   :  { %v894_v25 = vpop.f32.mrb[28].mxu1  ;;  %2071 = vmatpush3.bf16.msra.mxu0 %v907_v22 }
 0x6d3   :  { %v2066_v28 = vpop.f32.mrb[29].mxu1  ;;  %2084 = vmatprep.subr.bf16.mxu0 %v2237_v3 }
 0x6d4   :  { %v897_v31 = vpop.f32.mrb[30].mxu1 }
 0x6d5   :  { %v2067_v32 = vpop.f32.mrb[31].mxu1  ;;  %2073 = vmatmul.mubr.msk.bf16.vlgmr.msra.gmra.mrb[32].mxu0 %vm66_vm1, %v2334_v20 }
 0x6d6   :  { %2085 = vmatpush3.bf16.msra.mxu0 %v920_v26  ;;  %2088 = vmatprep.mubr.msk.bf16.mxu0 %vm2238_vm0, %v2237_v3 }
 0x6d7   :  { %2086 = vmatprep.subr.bf16.mxu0 %v2237_v3 }
 0x6da   :  { %2087 = vmatpush3.bf16.msra.mxu0 %v921_v33  ;;  %v1010_v35 = vpop.f32.mrb[32].mxu1 }
 0x6db   :  { %2098 = vmatprep.subr.bf16.mxu0 %v2237_v3  ;;  %v1011_v36 = vadd.f32 %v1847_v34, %v1010_v35  ;;  %v2082_v37 = vpop.f32.mrb[33].mxu1  ;;  %v1855_v35 = vld [vmem:[%s2729_s5 + $0x10] sm:$0xff] }
 0x6dc   :  { %v1013_v38 = vpop.f32.mrb[34].mxu1 }
 0x6dd   :  { %2089 = vmatmul.mubr.msk.bf16.vlgmr.msra.gmra.mrb[36].mxu0 %vm66_vm1, %v2360_v27  ;;  %v1064_v39 = vpack.c.bf16 %v1011_v36, %v1011_v36  ;;  %v1014_v40 = vadd.f32 %v1847_v34, %v1013_v38  ;;  %v2083_v41 = vpop.f32.mrb[35].mxu1  ;;  %v1278_v36 = vpack.c.bf16 %v1855_v35, %v1855_v35 }
 0x6de   :  { %2100 = vmatprep.mubr.msk.bf16.mxu0 %vm2238_vm0, %v2237_v3 }
 0x6df   :  { %v1072_v42 = vsel %vm215_vm2, %v1064_v39, 0  ;;  %v1065_v43 = vpack.c.bf16 %v1014_v40, %v1014_v40 }
 0x6e0   :  { %2093 = vmatpush3.bf16.xpose.msra.mxu1 %v1072_v42  ;;  %v1284_v42 = vsel %vm335_vm3, %v1278_v36, 0  ;;  %v1875_v36 = vld [vmem:[%s2728_s4 + $0xb] ss:$0 sm:$0xff] }
 0x6e1   :  { %v1118_v44 = vsel %vm215_vm2, %v1065_v43, 0  ;;  %2104 = vmatprep.subr.bf16.mxu1 %v2237_v3 }
 0x6e3   :  { %2099 = vmatpush3.bf16.xpose.msra.mxu0 %v1118_v44  ;;  %v1857_v44 = vld [vmem:[%s2727_s3 + $0x60] sm:$0xff] }
 0x6e4   :  { %2110 = vmatprep.subr.bf16.mxu0 %v2237_v3 }
 0x7a0   :  { %v847_v45 = vpop.f32.mrb[28].mxu0 }
 0x7a1   :  { %v2572_v46 = vadd.f32 %v894_v25, %v847_v45  ;;  %v2060_v48 = vpop.f32.mrb[29].mxu0  ;;  %v1858_v45 = vld [vmem:[%s2727_s3 + $0x68] sm:$0xff] }
 0x7a2   :  { %v850_v49 = vpop.f32.mrb[30].mxu0  ;;  %v1334_v48 = vpack.c.bf16 %v1858_v45, %v1857_v44 }
 0x7a3   :  { %v2574_v50 = vadd.f32 %v897_v31, %v850_v49  ;;  %v2061_v53 = vpop.f32.mrb[31].mxu0  ;;  %v1859_v49 = vld [vmem:[%s2727_s3 + $0x70] sm:$0xff] }
 0x7a4   :  { %v1860_v53 = vld [vmem:[%s2727_s3 + $0x78] sm:$0xff] }
 0x7a8   :  { %v963_v55 = vpop.f32.mrb[32].mxu0 }
 0x7a9   :  { %v964_v56 = vadd.f32 %v1845_v54, %v963_v55  ;;  %v2074_v57 = vpop.f32.mrb[33].mxu0  ;;  %v1861_v55 = vld [vmem:[%s2727_s3 + $0xe0] sm:$0xff] }
 0x7aa   :  { %v966_v58 = vpop.f32.mrb[34].mxu0 }
 0x7ab   :  { %v970_v59 = vmul.f32 0.35355338, %v964_v56  ;;  %v967_v60 = vadd.f32 %v1845_v54, %v966_v58  ;;  %v2075_v61 = vpop.f32.mrb[35].mxu0  ;;  %v1335_v54 = vpack.c.bf16 %v1860_v53, %v1859_v49  ;;  %v1862_v56 = vld [vmem:[%s2727_s3 + $0xe8] sm:$0xff] }
 0x7ac   :  { %v1341_v61 = vpack.c.bf16 %v1862_v56, %v1861_v55 }
 0x7ad   :  { %v1062_v62 = vpack.c.bf16 %v970_v59, %v970_v59  ;;  %v971_v63 = vmul.f32 0.35355338, %v967_v60 }
 0x7af   :  { %v1063_v1 = vpack.c.bf16 %v971_v63, %v971_v63  ;;  %2095 = vmatmul.mubr.msk.bf16.vlgmr.msra.gmra.mrb[36].mxu1 %vm215_vm2, %v1062_v62 }
 0x7b0   :  { %v1055_v2 = vpop.f32.mrb[36].mxu0  ;;  %2106 = vmatprep.mubr.msk.bf16.mxu1 %vm2238_vm0, %v2237_v3 }
 0x7b1   :  { %2101 = vmatmul.mubr.msk.bf16.vlgmr.msra.gmra.mrb[40].mxu0 %vm215_vm2, %v1063_v1  ;;  %v1056_v4 = vadd.f32 %v1849_v0, %v1055_v2  ;;  %v2090_v5 = vpop.f32.mrb[37].mxu0  ;;  %v1864_v1 = vld [vmem:[%s2727_s3 + $0xf8] sm:$0xff] }
 0x7b2   :  { %v1058_v6 = vpop.f32.mrb[38].mxu0  ;;  %2112 = vmatprep.mubr.msk.bf16.mxu0 %vm2238_vm0, %v2237_v3 }
 0x7b3   :  { %v1066_v7 = vpack.c.bf16 %v1056_v4, %v1056_v4  ;;  %v1059_v8 = vadd.f32 %v1849_v0, %v1058_v6  ;;  %v2091_v47 = vpop.f32.mrb[39].mxu0  ;;  %v1865_v6 = vld [vmem:[%s2727_s3 + $0x160] sm:$0xff] }
 0x7b4   :  { %v1867_v47 = vld [vmem:[%s2727_s3 + $0x170] sm:$0xff] }
 0x7b5   :  { %v1188_v51 = vsel %vm335_vm3, %v1066_v7, 0  ;;  %v1067_v52 = vpack.c.bf16 %v1059_v8, %v1059_v8  ;;  %v1866_v7 = vld [vmem:[%s2727_s3 + $0x168] sm:$0xff] }
 0x7b6   :  { %2105 = vmatpush3.bf16.msra.mxu1 %v1188_v51  ;;  %v1348_v8 = vpack.c.bf16 %v1866_v7, %v1865_v6 }
 0x7b7   :  { %v1234_v9 = vsel %vm335_vm3, %v1067_v52, 0  ;;  %2116 = vmatprep.subr.bf16.mxu1 %v2237_v3 }
 0x7b8   :  { %2111 = vmatpush3.bf16.msra.mxu0 %v1234_v9 }
 0x7b9   :  { %2122 = vmatprep.subr.bf16.mxu0 %v2237_v3 }
 0x882   :  { %v1108_v10 = vpop.f32.mrb[36].mxu1 }
 0x883   :  { %v2096_v11 = vpop.f32.mrb[37].mxu1  ;;  %v1160_v12 = vsel %vm215_vm2, %v1108_v10, -inf }
 0x884   :  { %1161 = vmax.xlane.f32.xlu0 %v1160_v12  ;;  %v1111_v13 = vpop.f32.mrb[38].mxu1  ;;  %v1154_v14 = vpop.f32.mrb[40].mxu0 }
 0x885   :  { %v2097_v15 = vpop.f32.mrb[39].mxu1  ;;  %v2102_v16 = vpop.f32.mrb[41].mxu0  ;;  %v1163_v17 = vsel %vm215_vm2, %v1154_v14, -inf }
 0x886   :  { %1164 = vmax.xlane.f32.xlu1 %v1163_v17  ;;  %v1157_v18 = vpop.f32.mrb[42].mxu0 }
 0x887   :  { %v2103_v21 = vpop.f32.mrb[43].mxu0  ;;  %v1871_v18 = vld [vmem:[%s2728_s4 + $0x3] ss:$0 sm:$0xff] }
 0x911   :  { %v1162_v22 = vpop.xlane.xlu0 %1161 }
 0x912   :  { %v1166_v23 = vsub.f32 %v1108_v10, %v1162_v22 }
 0x913   :  { %v1165_v24 = vpop.xlane.xlu1 %1164 }
 0x914   :  { %v1168_v25 = vmul.f32 1.442695, %v1166_v23  ;;  %v1167_v26 = vsub.f32 %v1154_v14, %v1165_v24 }
 0x916   :  { %2197 = vpow2.f32 %v1168_v25  ;;  %v1170_v28 = vmul.f32 1.442695, %v1167_v26 }
 0x918   :  { %2199 = vpow2.f32 %v1170_v28 }
 0x920   :  { %v2198_v29 = vpop.eup %2197 }
 0x921   :  { %v1172_v30 = vsel %vm215_vm2, %v2198_v29, 0.0 }
 0x922   :  { %v2200_v31 = vpop.eup %2199  ;;  %1173 = vadd.xlane.f32.xlu0 %v1172_v30 }
 0x923   :  { %v1175_v32 = vsel %vm215_vm2, %v2200_v31, 0.0 }
 0x924   :  { %1176 = vadd.xlane.f32.xlu1 %v1175_v32 }
 0x9af   :  { %v1174_v33 = vpop.xlane.xlu0 %1173 }
 0x9b0   :  { %2201 = vrcp.f32 %v1174_v33 }
 0x9b1   :  { %v1177_v34 = vpop.xlane.xlu1 %1176 }
 0x9b2   :  { %2203 = vrcp.f32 %v1177_v34 }
 0x9ba   :  { %v2202_v37 = vpop.eup %2201 }
 0x9bb   :  { %v1180_v38 = vmul.f32 %v2202_v37, %v2198_v29 }
 0x9bc   :  { %v2204_v39 = vpop.eup %2203 }
 0x9bd   :  { %v1181_v40 = vmul.f32 %v2204_v39, %v2200_v31  ;;  %v1182_v41 = vpack.c.bf16 %v1180_v38, %v1180_v38 }
 0x9bf   :  { %2107 = vmatmul.mubr.msk.bf16.vlgmr.msra.gmra.mrb[40].mxu1 %vm215_vm2, %v1182_v41  ;;  %v1183_v43 = vpack.c.bf16 %v1181_v40, %v1181_v40 }
 0x9c0   :  { %2117 = vmatpush3.bf16.msra.mxu1 %v1284_v42  ;;  %2118 = vmatprep.mubr.msk.bf16.mxu1 %vm2238_vm0, %v2237_v3 }
 0x9c1   :  { %2113 = vmatmul.mubr.msk.bf16.vlgmr.msra.gmra.mrb[44].mxu0 %vm215_vm2, %v1183_v43  ;;  %2130 = vmatprep.subr.bf16.mxu1 %v2237_v3 }
 0x9c2   :  { %2126 = vmatprep.mubr.msk.bf16.mxu0 %vm2238_vm0, %v2237_v3  ;;  %2123 = vmatpush3.bf16.msra.mxu0 %v1334_v48 }
 0x9c3   :  { %2124 = vmatprep.subr.bf16.mxu0 %v2237_v3 }
 0x9c6   :  { %2125 = vmatpush3.bf16.msra.mxu0 %v1335_v54 }
 0x9c7   :  { %2138 = vmatprep.subr.bf16.mxu0 %v2237_v3 }
 0x9c9   :  { %2127 = vmatmul.mubr.msk.bf16.vlgmr.msra.gmra.mrb[48].mxu0 %vm66_vm1, %v2334_v20  ;;  %v1863_v20 = vld [vmem:[%s2727_s3 + $0xf0] sm:$0xff] }
 0x9ca   :  { %2142 = vmatprep.mubr.msk.bf16.mxu0 %vm2238_vm0, %v2237_v3  ;;  %v1342_v5 = vpack.c.bf16 %v1864_v1, %v1863_v20  ;;  %2139 = vmatpush3.bf16.msra.mxu0 %v1348_v8 }
 0x9cb   :  { %2140 = vmatprep.subr.bf16.mxu0 %v2237_v3 }
 0xa92   :  { %v1224_v57 = vpop.f32.mrb[40].mxu1 }
 0xa93   :  { %v2108_v58 = vpop.f32.mrb[41].mxu1 }
 0xa94   :  { %v1227_v59 = vpop.f32.mrb[42].mxu1  ;;  %v1270_v60 = vpop.f32.mrb[44].mxu0 }
 0xa95   :  { %v1279_v62 = vpack.c.bf16 %v1270_v60, %v1224_v57  ;;  %v2109_v63 = vpop.f32.mrb[43].mxu1  ;;  %v2114_v0 = vpop.f32.mrb[45].mxu0 }
 0xa96   :  { %v1273_v2 = vpop.f32.mrb[46].mxu0 }
 0xa97   :  { %v2115_v4 = vpop.f32.mrb[47].mxu0  ;;  %2119 = vmatmul.mubr.msk.bf16.vlgmr.msra.gmra.mrb[44].mxu1 %vm215_vm2, %v1279_v62 }
 0xa98   :  { %2131 = vmatpush3.bf16.msra.mxu1 %v1341_v61  ;;  %2134 = vmatprep.mubr.msk.bf16.mxu1 %vm2238_vm0, %v2237_v3 }
 0xa99   :  { %2132 = vmatprep.subr.bf16.mxu1 %v2237_v3 }
 0xa9c   :  { %2133 = vmatpush3.bf16.msra.mxu1 %v1342_v5  ;;  %v1391_v52 = vpop.f32.mrb[48].mxu0 }
 0xa9d   :  { %2146 = vmatprep.subr.bf16.mxu1 %v2237_v3  ;;  %v2128_v9 = vpop.f32.mrb[49].mxu0  ;;  %v1392_v24 = vadd.f32 %v1871_v18, %v1391_v52 }
 0xa9e   :  { %v1394_v10 = vpop.f32.mrb[50].mxu0 }
 0xa9f   :  { %2135 = vmatmul.mubr.msk.bf16.vlgmr.msra.gmra.mrb[48].mxu1 %vm66_vm1, %v2332_v19  ;;  %v1868_v19 = vld [vmem:[%s2727_s3 + $0x178] sm:$0xff]  ;;  %v2129_v11 = vpop.f32.mrb[51].mxu0  ;;  %v1398_v30 = vmul.f32 0.35355338, %v1392_v24  ;;  %v1395_v31 = vadd.f32 %v1871_v18, %v1394_v10 }
 0xaa0   :  { %2148 = vmatprep.mubr.msk.bf16.mxu1 %vm2238_vm0, %v2237_v3  ;;  %v1349_v51 = vpack.c.bf16 %v1868_v19, %v1867_v47  ;;  %v1881_v19 = vld [vmem:[%s2729_s5 + $0x18] sm:$0xff] }
 0xaa1   :  { %v1490_v33 = vpack.c.bf16 %v1398_v30, %v1398_v30  ;;  %v1399_v34 = vmul.f32 0.35355338, %v1395_v31 }
 0xaa2   :  { %2141 = vmatpush3.bf16.msra.mxu0 %v1349_v51  ;;  %v1706_v51 = vpack.c.bf16 %v1881_v19, %v1881_v19 }
 0xaa3   :  { %2152 = vmatprep.subr.bf16.mxu0 %v2237_v3  ;;  %v1491_v35 = vpack.c.bf16 %v1399_v34, %v1399_v34 }
 0xaa5   :  { %2143 = vmatmul.mubr.msk.bf16.vlgmr.msra.gmra.mrb[52].mxu0 %vm66_vm1, %v2360_v27  ;;  %v1873_v27 = vld [vmem:[%s2728_s4 + $0x7] ss:$0 sm:$0xff] }
 0xaa6   :  { %2154 = vmatprep.mubr.msk.bf16.mxu0 %vm2238_vm0, %v2237_v3 }
 0xb6a   :  { %v1320_v12 = vpop.f32.mrb[44].mxu1 }
 0xb6b   :  { %v2665_v13 = vadd.f32 %v1320_v12, %v2572_v46  ;;  %v2120_v14 = vpop.f32.mrb[45].mxu1 }
 0xb6c   :  { %v1323_v15 = vpop.f32.mrb[46].mxu1  ;;  %v1712_v14 = vsel %vm335_vm3, %v1706_v51, 0 }
 0xb6d   :  { %v2668_v16 = vadd.f32 %v1323_v15, %v2574_v50  ;;  %v2121_v17 = vpop.f32.mrb[47].mxu1 }
 0xb72   :  { %v1438_v21 = vpop.f32.mrb[48].mxu1 }
 0xb73   :  { %v1439_v22 = vadd.f32 %v1873_v27, %v1438_v21  ;;  %v2136_v23 = vpop.f32.mrb[49].mxu1 }
 0xb74   :  { %v1441_v46 = vpop.f32.mrb[50].mxu1 }
 0xb75   :  { %v1492_v25 = vpack.c.bf16 %v1439_v22, %v1439_v22  ;;  %v1442_v26 = vadd.f32 %v1873_v27, %v1441_v46  ;;  %v2137_v28 = vpop.f32.mrb[51].mxu1 }
 0xb76   :  { %v1883_v28 = vld [vmem:[%s2730_s6] ss:$0 sm:$0xff] }
 0xb77   :  { %v1500_v50 = vsel %vm215_vm2, %v1492_v25, 0  ;;  %v1493_v29 = vpack.c.bf16 %v1442_v26, %v1442_v26 }
 0xb78   :  { %2147 = vmatpush3.bf16.xpose.msra.mxu1 %v1500_v50  ;;  %v1483_v37 = vpop.f32.mrb[52].mxu0 }
 0xb79   :  { %v1546_v32 = vsel %vm215_vm2, %v1493_v29, 0  ;;  %2158 = vmatprep.subr.bf16.mxu1 %v2237_v3  ;;  %v1484_v38 = vadd.f32 %v1875_v36, %v1483_v37  ;;  %v2144_v39 = vpop.f32.mrb[53].mxu0 }
 0xb7a   :  { %2153 = vmatpush3.bf16.xpose.msra.mxu0 %v1546_v32  ;;  %v1486_v40 = vpop.f32.mrb[54].mxu0 }
 0xb7b   :  { %2164 = vmatprep.subr.bf16.mxu0 %v2237_v3  ;;  %v1494_v41 = vpack.c.bf16 %v1484_v38, %v1484_v38  ;;  %v1487_v42 = vadd.f32 %v1875_v36, %v1486_v40  ;;  %v2145_v43 = vpop.f32.mrb[55].mxu0 }
 0xb7d   :  { %v1616_v44 = vsel %vm335_vm3, %v1494_v41, 0  ;;  %v1495_v45 = vpack.c.bf16 %v1487_v42, %v1487_v42 }
 0xb7f   :  { %2149 = vmatmul.mubr.msk.bf16.vlgmr.msra.gmra.mrb[52].mxu1 %vm215_vm2, %v1490_v33  ;;  %v1662_v48 = vsel %vm335_vm3, %v1495_v45, 0 }
 0xb80   :  { %2160 = vmatprep.mubr.msk.bf16.mxu1 %vm2238_vm0, %v2237_v3  ;;  %2159 = vmatpush3.bf16.msra.mxu1 %v1616_v44 }
 0xb81   :  { %2155 = vmatmul.mubr.msk.bf16.vlgmr.msra.gmra.mrb[56].mxu0 %vm215_vm2, %v1491_v35  ;;  %2170 = vmatprep.subr.bf16.mxu1 %v2237_v3 }
 0xb82   :  { %2166 = vmatprep.mubr.msk.bf16.mxu0 %vm2238_vm0, %v2237_v3  ;;  %2165 = vmatpush3.bf16.msra.mxu0 %v1662_v48 }
 0xc52   :  { %v1536_v49 = vpop.f32.mrb[52].mxu1 }
 0xc53   :  { %v2150_v53 = vpop.f32.mrb[53].mxu1  ;;  %v1588_v54 = vsel %vm215_vm2, %v1536_v49, -inf }
 0xc54   :  { %1589 = vmax.xlane.f32.xlu0 %v1588_v54  ;;  %v1539_v55 = vpop.f32.mrb[54].mxu1  ;;  %v1582_v56 = vpop.f32.mrb[56].mxu0 }
 0xc55   :  { %v2151_v57 = vpop.f32.mrb[55].mxu1  ;;  %v2156_v58 = vpop.f32.mrb[57].mxu0  ;;  %v1591_v59 = vsel %vm215_vm2, %v1582_v56, -inf }
 0xc56   :  { %1592 = vmax.xlane.f32.xlu1 %v1591_v59  ;;  %v1585_v60 = vpop.f32.mrb[58].mxu0 }
 0xc57   :  { %v2157_v61 = vpop.f32.mrb[59].mxu0 }
 0xce1   :  { %v1590_v62 = vpop.xlane.xlu0 %1589 }
 0xce2   :  { %v1594_v63 = vsub.f32 %v1536_v49, %v1590_v62 }
 0xce3   :  { %v1593_v0 = vpop.xlane.xlu1 %1592 }
 0xce4   :  { %v1596_v20 = vmul.f32 1.442695, %v1594_v63  ;;  %v1595_v1 = vsub.f32 %v1582_v56, %v1593_v0 }
 0xce6   :  { %2205 = vpow2.f32 %v1596_v20  ;;  %v1598_v2 = vmul.f32 1.442695, %v1595_v1 }
 0xce8   :  { %2207 = vpow2.f32 %v1598_v2 }
 0xcf0   :  { %v2206_v4 = vpop.eup %2205 }
 0xcf1   :  { %v1600_v5 = vsel %vm215_vm2, %v2206_v4, 0.0 }
 0xcf2   :  { %v2208_v6 = vpop.eup %2207  ;;  %1601 = vadd.xlane.f32.xlu0 %v1600_v5 }
 0xcf3   :  { %v1603_v7 = vsel %vm215_vm2, %v2208_v6, 0.0 }
 0xcf4   :  { %1604 = vadd.xlane.f32.xlu1 %v1603_v7 }
 0xd7f   :  { %v1602_v8 = vpop.xlane.xlu0 %1601 }
 0xd80   :  { %2209 = vrcp.f32 %v1602_v8 }
 0xd81   :  { %v1605_v47 = vpop.xlane.xlu1 %1604 }
 0xd82   :  { %2211 = vrcp.f32 %v1605_v47 }
 0xd8a   :  { %v2210_v52 = vpop.eup %2209 }
 0xd8b   :  { %v1608_v9 = vmul.f32 %v2210_v52, %v2206_v4 }
 0xd8c   :  { %v2212_v10 = vpop.eup %2211 }
 0xd8d   :  { %v1610_v11 = vpack.c.bf16 %v1608_v9, %v1608_v9  ;;  %v1609_v12 = vmul.f32 %v2212_v10, %v2208_v6 }
 0xd8f   :  { %v1611_v15 = vpack.c.bf16 %v1609_v12, %v1609_v12  ;;  %2161 = vmatmul.mubr.msk.bf16.vlgmr.msra.gmra.mrb[56].mxu1 %vm215_vm2, %v1610_v11 }
 0xd90   :  { %2171 = vmatpush3.bf16.msra.mxu1 %v1712_v14  ;;  %2172 = vmatprep.mubr.msk.bf16.mxu1 %vm2238_vm0, %v2237_v3 }
 0xd91   :  { %2167 = vmatmul.mubr.msk.bf16.vlgmr.msra.gmra.mrb[60].mxu0 %vm215_vm2, %v1611_v15 }
 0xe62   :  { %v1652_v17 = vpop.f32.mrb[56].mxu1 }
 0xe63   :  { %v2162_v27 = vpop.f32.mrb[57].mxu1 }
 0xe64   :  { %v1655_v18 = vpop.f32.mrb[58].mxu1  ;;  %v1698_v21 = vpop.f32.mrb[60].mxu0 }
 0xe65   :  { %v1707_v22 = vpack.c.bf16 %v1698_v21, %v1652_v17  ;;  %v2163_v23 = vpop.f32.mrb[59].mxu1  ;;  %v2168_v24 = vpop.f32.mrb[61].mxu0 }
 0xe66   :  { %v1701_v46 = vpop.f32.mrb[62].mxu0 }
 0xe67   :  { %v2169_v25 = vpop.f32.mrb[63].mxu0  ;;  %2173 = vmatmul.mubr.msk.bf16.vlgmr.msra.gmra.mrb[60].mxu1 %vm215_vm2, %v1707_v22 }
 0xf3a   :  { %v1748_v26 = vpop.f32.mrb[60].mxu1 }
 0xf3b   :  { %v1755_v3 = vadd.f32 %v1748_v26, %v2665_v13  ;;  %v2174_v50 = vpop.f32.mrb[61].mxu1 }
 0xf3c   :  { %v1751_v29 = vpop.f32.mrb[62].mxu1 }
 0xf3d   :  { %v1764_v30 = vadd.f32 %v1883_v28, %v1755_v3  ;;  %v1756_v31 = vadd.f32 %v1751_v29, %v2668_v16  ;;  %v2175_v32 = vpop.f32.mrb[63].mxu1 }
 0xf3f   :  { %1766 = vst.msk [vmem:[#allocation2] sm:$0xff] %vm66_vm1, %v1764_v30  ;;  %v1765_v33 = vadd.f32 %v1883_v28, %v1756_v31 }
 0xf41   :  { %1767 = vst.msk [vmem:[#allocation2 + $0x8] sm:$0xff] %vm66_vm1, %v1765_v33 }
 0xf42   :  { %2224 = shalt.err (!%p2221_p4)
}
 0xf43   :  { %s2225_s15 = scalar_lea.hbm %s2731_s7, 256 }
 0xf44   :  { %p2226_p5 = scmp.ne.s32.totalorder %s2731_s7, %s2225_s15  ;;  %p2229_p6 = scmp.lt.u32.totalorder %s2225_s15, %s2731_s7 }
 0xf46   :  { %p2231_p7 = pnand %p2229_p6, %p2226_p5 }
 0xf48   :  { %2234 = shalt.err (!%p2231_p7)
}
 0xf49   :  { %s2240_s19 = smov 128   ;;  %s2241_s20 = smov 8  }
 0xf4a   :  { %1779 = dma.vmem_to_hbm [thread:$0]  %s1774_s12, 256, %s2731_s7, [#allocation3], %s2240_s19, %s2240_s19, %s2241_s20  }
 0xf4b   :  { %2235 = dma.done.wait [#allocation3], 256  }
 0xf4c   :  { %2236 = vsyncadd [#allocation3], 4294967040 }
 0xf4d   :  { %1783 = vsyncpa [#allocation3], 1 }

</bundles_post_ra>
